<compile_context>
chip_gen: v6e
topology: v6e:2x2x1
jax: 0.10.0
libtpu: 0.0.40
codegen_flags: <defaults>
</compile_context>

<pallas_src>
import functools

import jax
import jax.numpy as jnp
import numpy as np
from jax.experimental import pallas as pl
from jax.experimental.pallas import tpu as pltpu


def _receiver_kernel(x_ref, w_ref, b_ref, o_ref):
    # x_ref: (tm, D) batch tile (VMEM, native dtype); w_ref: (2, D) resident (VMEM);
    # b_ref: (2,) SMEM scalars; o_ref: (tm, 2) output tile (class axis = full extent).
    x = x_ref[...]                       # no upcast: bf16 goes straight to the MXU
    w = w_ref[...]                       # (2, D)

    # Full 2-class logits on the MXU, f32 accumulation, default precision.
    logits = jnp.einsum("bd,cd->bc", x, w,
                        preferred_element_type=jnp.float32)          # (tm, 2)

    # 2-class softmax == sigmoid of the logit difference.
    zd = (logits[:, 1:2] - logits[:, 0:1]) + (b_ref[1] - b_ref[0])    # (tm, 1)

    # Stable sigmoid pair: exp(-|zd|) in (0, 1], small class formed as e*r so both
    # classes keep relative accuracy; rows always sum to 1 up to f32 rounding.
    e = jnp.exp(-jnp.abs(zd))            # EUP
    r = 1.0 / (1.0 + e)
    p_big = r                            # sigmoid(|zd|)
    p_small = e * r                      # sigmoid(-|zd|)
    pos = zd >= 0.0

    o_ref[:, 0:1] = jnp.where(pos, p_small, p_big).astype(o_ref.dtype)   # class 0
    o_ref[:, 1:2] = jnp.where(pos, p_big, p_small).astype(o_ref.dtype)   # class 1


def _pick_batch_tile(B, D, itemsize, vmem_budget_bytes=16 * 1024 * 1024):
    """Largest multiple-of-128 row tile whose double-buffered x slab fits the budget.

    16 MiB double-buffered => >= 8 MiB of x streamed per grid step, which keeps the
    ~0.35 us per-step overhead negligible even at v7x HBM bandwidth. Small batches
    (B <= tile) collapse to a single grid step. Sweep via the block_b argument.
    """
    tm = (vmem_budget_bytes // (2 * D * itemsize)) // 128 * 128
    tm = int(max(128, tm))
    return B if B <= tm else tm


@functools.partial(jax.jit, static_argnames=("block_b",))
def receiver_chexpert_forward(channel_input, weight, bias, block_b=None):
    """channel_input: (B, D); weight: (2, D) (PyTorch nn.Linear layout); bias: (2,)."""
    B, D = channel_input.shape
    C = weight.shape[0]
    assert C == 2 and bias.shape == (C,)

    # SMEM scalars are 32-bit; this is a no-op for f32 params (no extra dispatch).
    if bias.dtype != jnp.float32:
        bias = bias.astype(jnp.float32)

    if block_b is None:
        block_b = _pick_batch_tile(B, D, channel_input.dtype.itemsize)
    tm = B if B <= block_b else max(128, (int(block_b) // 128) * 128)
    tm = min(tm, B)
    grid = (pl.cdiv(B, tm),)

    cost = pl.CostEstimate(
        flops=2 * B * D * C + 10 * B,
        transcendentals=B,
        bytes_accessed=(B * D * channel_input.dtype.itemsize
                        + C * D * weight.dtype.itemsize + C * 4 + B * C * 4),
    )

    out = pl.pallas_call(
        _receiver_kernel,
        out_shape=jax.ShapeDtypeStruct((B, C), jnp.float32),
        grid_spec=pltpu.PrefetchScalarGridSpec(
            num_scalar_prefetch=0,
            grid=grid,
            in_specs=[
                pl.BlockSpec((tm, D), lambda i: (i, 0)),             # x: tiled over batch
                pl.BlockSpec((C, D), lambda i: (0, 0)),              # weight: resident
                pl.BlockSpec(memory_space=pltpu.MemorySpace.SMEM),   # bias: SMEM scalars
            ],
            out_specs=pl.BlockSpec((tm, C), lambda i: (i, 0)),       # (tm, 2) direct
        ),
        compiler_params=pltpu.CompilerParams(
            dimension_semantics=("parallel",),      # shard batch tiles across TCs
            vmem_limit_bytes=48 * 1024 * 1024,      # headroom under v7x's 64 MiB/TC
        ),
        cost_estimate=cost,
    )(channel_input, weight, bias)

    return out  # (B, 2), softmax over the class axis


if __name__ == "__main__":
    # input_size=512 is the module default; small batch keeps the test fast.
    B, D, C = 256, 512, 2

    key = jax.random.PRNGKey(0)
    kx, kw, kb = jax.random.split(key, 3)
    x = jax.random.normal(kx, (B, D), dtype=jnp.float32)
    weight = jax.random.normal(kw, (C, D), dtype=jnp.float32) * (1.0 / jnp.sqrt(D))
    bias = jax.random.normal(kb, (C,), dtype=jnp.float32) * 0.1

    # Precision-independent float64 host reference.
    xn = np.asarray(x, dtype=np.float64)
    wn = np.asarray(weight, dtype=np.float64)
    bn = np.asarray(bias, dtype=np.float64)
    logits = xn @ wn.T + bn
    eref = np.exp(logits - logits.max(axis=-1, keepdims=True))
    ref = eref / eref.sum(axis=-1, keepdims=True)

    # Default path: whole batch in one grid step.
    out = jax.block_until_ready(receiver_chexpert_forward(x, weight, bias))
    assert out.shape == (B, C)
    # Default (single-pass) MXU precision at D=512 gives ~1e-3-level error vs f64.
    np.testing.assert_allclose(np.asarray(out), ref, atol=5e-3, rtol=5e-3)
    assert np.allclose(np.asarray(out).sum(axis=-1), 1.0, atol=1e-5)

    # Tiled path: 2 balanced 128-row tiles (exercises the pipelined grid).
    out_tiled = jax.block_until_ready(
        receiver_chexpert_forward(x, weight, bias, block_b=128))
    np.testing.assert_allclose(np.asarray(out_tiled), ref, atol=5e-3, rtol=5e-3)

    # Small-batch path (single full-array block).
    out_small = jax.block_until_ready(receiver_chexpert_forward(x[:8], weight, bias))
    np.testing.assert_allclose(np.asarray(out_small), ref[:8], atol=5e-3, rtol=5e-3)

    print("KERNEL_OK")
</pallas_src>

<mosaic_0001>
module attributes {stable_mosaic.version = 11 : i64} {
  func.func @_receiver_kernel(%arg0: i32, %arg1: memref<256x512xf32, #tpu.memory_space<vmem>>, %arg2: memref<2x512xf32, #tpu.memory_space<vmem>>, %arg3: memref<2xf32, #tpu.memory_space<smem>>, %arg4: memref<256x2xf32, #tpu.memory_space<vmem>>) attributes {dimension_semantics = [#tpu.dimension_semantics<parallel>], iteration_bounds = array<i64: 1>, scalar_prefetch = 0 : i64, scratch_operands = 0 : i64, tpu.core_type = #tpu.core_type<tc>, window_params = [{transform_indices = @transform_0, window_bounds = array<i64: 256, 512>}, {pipeline_mode = #tpu.pipeline_mode<synchronous>, transform_indices = @transform_1, window_bounds = array<i64: 2, 512>}, {transform_indices = @transform_2, window_bounds = array<i64: 2>}, {transform_indices = @transform_3, window_bounds = array<i64: 256, 2>}]} {
    %c0 = arith.constant 0 : index
    %c0_0 = arith.constant 0 : index
    %0 = vector.load %arg1[%c0, %c0_0] : memref<256x512xf32, #tpu.memory_space<vmem>>, vector<256x512xf32>
    %c0_1 = arith.constant 0 : index
    %c0_2 = arith.constant 0 : index
    %1 = vector.load %arg2[%c0_1, %c0_2] : memref<2x512xf32, #tpu.memory_space<vmem>>, vector<2x512xf32>
    "tpu.trace_start"() <{level = 10 : i32, message = "bd,cd->bc"}> : () -> ()
    %cst = arith.constant dense<0.000000e+00> : vector<256x2xf32>
    %2 = tpu.matmul %0, %1, %cst {dimension_numbers = #tpu.dot_dimension_numbers<[1], [1], [0], [0], [0, 0, 1, 0], [], []>} : vector<256x512xf32>, vector<2x512xf32>, vector<256x2xf32> -> vector<256x2xf32>
    "tpu.trace_stop"() : () -> ()
    %3 = vector.extract_strided_slice %2 {offsets = [0, 1], sizes = [256, 1], strides = [1, 1]} : vector<256x2xf32> to vector<256x1xf32>
    %4 = vector.extract_strided_slice %2 {offsets = [0, 0], sizes = [256, 1], strides = [1, 1]} : vector<256x2xf32> to vector<256x1xf32>
    %5 = arith.subf %3, %4 : vector<256x1xf32>
    %c1 = arith.constant 1 : index
    %6 = memref.load %arg3[%c1] : memref<2xf32, #tpu.memory_space<smem>>
    %c0_3 = arith.constant 0 : index
    %7 = memref.load %arg3[%c0_3] : memref<2xf32, #tpu.memory_space<smem>>
    %8 = arith.subf %6, %7 : f32
    %9 = vector.broadcast %8 : f32 to vector<256x1xf32>
    %10 = arith.addf %5, %9 : vector<256x1xf32>
    %11 = math.absf %10 : vector<256x1xf32>
    %cst_4 = arith.constant 0.000000e+00 : f32
    %12 = vector.broadcast %cst_4 : f32 to vector<256x1xf32>
    %13 = arith.subf %12, %11 : vector<256x1xf32>
    %14 = math.exp %13 : vector<256x1xf32>
    %cst_5 = arith.constant 1.000000e+00 : f32
    %15 = vector.broadcast %cst_5 : f32 to vector<256x1xf32>
    %16 = arith.addf %15, %14 : vector<256x1xf32>
    %cst_6 = arith.constant 1.000000e+00 : f32
    %17 = vector.broadcast %cst_6 : f32 to vector<256x1xf32>
    %18 = arith.divf %17, %16 : vector<256x1xf32>
    %19 = arith.mulf %14, %18 : vector<256x1xf32>
    %cst_7 = arith.constant 0.000000e+00 : f32
    %20 = vector.broadcast %cst_7 : f32 to vector<256x1xf32>
    %21 = arith.cmpf oge, %10, %20 : vector<256x1xf32>
    %22 = arith.select %21, %19, %18 : vector<256x1xi1>, vector<256x1xf32>
    %c0_8 = arith.constant 0 : index
    %c0_9 = arith.constant 0 : index
    %23 = vector.load %arg4[%c0_8, %c0_9] : memref<256x2xf32, #tpu.memory_space<vmem>>, vector<256x1xf32>
    tpu.vector_store %arg4[%c0_8, %c0_9], %22 {strides = array<i32>} : memref<256x2xf32, #tpu.memory_space<vmem>>, vector<256x1xf32>,
    %24 = arith.select %21, %18, %19 : vector<256x1xi1>, vector<256x1xf32>
    %c0_10 = arith.constant 0 : index
    %c1_11 = arith.constant 1 : index
    %25 = vector.load %arg4[%c0_10, %c1_11] : memref<256x2xf32, #tpu.memory_space<vmem>>, vector<256x1xf32>
    tpu.vector_store %arg4[%c0_10, %c1_11], %24 {strides = array<i32>} : memref<256x2xf32, #tpu.memory_space<vmem>>, vector<256x1xf32>,
    return
  }
  func.func @transform_0(%arg0: i32) -> (i32, i32) {
    %c0_i32 = arith.constant 0 : i32
    %c0_i32_0 = arith.constant 0 : i32
    return %arg0, %c0_i32 : i32, i32
  }
  func.func @transform_1(%arg0: i32) -> (i32, i32) {
    %c0_i32 = arith.constant 0 : i32
    %c0_i32_0 = arith.constant 0 : i32
    %c0_i32_1 = arith.constant 0 : i32
    return %c0_i32, %c0_i32_0 : i32, i32
  }
  func.func @transform_2(%arg0: i32) -> i32 {
    %c0_i32 = arith.constant 0 : i32
    %c0_i32_0 = arith.constant 0 : i32
    return %c0_i32 : i32
  }
  func.func @transform_3(%arg0: i32) -> (i32, i32) {
    %c0_i32 = arith.constant 0 : i32
    %c0_i32_0 = arith.constant 0 : i32
    return %arg0, %c0_i32 : i32, i32
  }
}

</mosaic_0001>

<bundles_post_ra>
// kernel: receiver_chexpert_forward.1
= control target key start
LH: loop header
LB: loop body
LE: loop exit
PB: predicated region body
PF: predicated region fallthrough
CT: control target
= control target key end

     0   :  { %8 = vsyncpa [#allocation3], 0  ;;  %s2426_s0 = inlined_call_operand.hbm [shape: f32[256,512], index: 0, kind: input, shape index: {}]   ;;  %s2427_s1 = inlined_call_operand.hbm [shape: f32[2,512], index: 1, kind: input, shape index: {}]   ;;  %s2428_s2 = inlined_call_operand.vmem [shape: f32[2], index: 2, kind: input, shape index: {}]   ;;  %s2429_s3 = inlined_call_operand.vmem [shape: f32[256,2], index: 3, kind: output, shape index: {}]  }
   0x1   :  { %9 = vsyncpa [#allocation6], 0 }
   0x2   :  { %10 = vsyncpa [#allocation4], 0  ;;  %s1599_s12 = smov [#allocation2]  }
   0x3   :  { %s16_s13 = sshll.u32 %s1599_s12, 4  ;;  %s17_s13 = int_to_ptr.vmem [resolvable:$true] %s16_s13 }
   0x4   :  { %s1549_s14 = scalar_lea.vmem %s17_s13, 16384  ;;  %p1554_p1 = scmp.lt.s32.totalorder %s17_s13, %s17_s13 }
   0x5   :  { %p1550_p0 = scmp.ne.s32.totalorder %s17_s13, %s1549_s14  ;;  %p1555_p2 = scmp.lt.s32.totalorder %s1549_s14, %s1549_s14 }
   0x7   :  { %p1556_p3 = por %p1555_p2, %p1554_p1 }
   0x9   :  { %p1557_p4 = pnand %p1556_p3, %p1550_p0 }
   0xb   :  { %1560 = shalt.err (!%p1557_p4)
}
   0xc   :  { %s1600_s15 = smov 512   ;;  %s1601_s16 = smov 32  }
   0xd   :  { %22 = dma.hbm_to_vmem [thread:$0]  %s2426_s0, 16384, %s17_s13, [#allocation3], %s1600_s15, %s1600_s15, %s1601_s16  }
   0xe   :  { %s1602_s19 = smov [#allocation5]   ;;  %s39_s23 = sshll.u32 %s2428_s2, 4  ;;  %s40_s23 = int_to_ptr.vmem [resolvable:$true] %s39_s23 }
   0xf   :  { %s29_s20 = sshll.u32 %s1602_s19, 4  ;;  %s30_s20 = int_to_ptr.vmem [resolvable:$true] %s29_s20 }
  0x10   :  { %s1569_s24 = scalar_lea.vmem %s30_s20, 128  ;;  %p1574_p6 = scmp.lt.s32.totalorder %s30_s20, %s30_s20 }
  0x11   :  { %p1570_p5 = scmp.ne.s32.totalorder %s30_s20, %s1569_s24  ;;  %p1575_p7 = scmp.lt.s32.totalorder %s1569_s24, %s1569_s24 }
  0x13   :  { %p1576_p8 = por %p1575_p7, %p1574_p6 }
  0x15   :  { %p1577_p9 = pnand %p1576_p8, %p1570_p5 }
  0x17   :  { %1580 = shalt.err (!%p1577_p9)
}
  0x18   :  { %32 = dma.hbm_to_vmem [thread:$0]  %s2427_s1, 128, %s30_s20, [#allocation6]  }
  0x19   :  { %s1581_s0 = scalar_lea.vmem %s40_s23, 16  ;;  %p1586_p11 = scmp.lt.s32.totalorder %s40_s23, %s40_s23 }
  0x1a   :  { %p1582_p10 = scmp.ne.s32.totalorder %s40_s23, %s1581_s0  ;;  %p1587_p12 = scmp.lt.s32.totalorder %s1581_s0, %s1581_s0 }
  0x1c   :  { %p1588_p13 = por %p1587_p12, %p1586_p11 }
  0x1e   :  { %p1589_p0 = pnand %p1588_p13, %p1582_p10 }
  0x20   :  { %1592 = shalt.err (!%p1589_p0)
}
  0x21   :  { %s1603_s2 = smov [#allocation7]  }
  0x22   :  { %42 = dma.vmem_to_smem %s40_s23, 16, %s1603_s2, [#allocation4]  }
  0x23   :  { %1593 = dma.done.wait [#allocation3], 16384  }
  0x24   :  { %1594 = vsyncadd [#allocation3], 4294950912 }
  0x25   :  { %1595 = dma.done.wait [#allocation6], 128  }
  0x26   :  { %1596 = vsyncadd [#allocation6], 4294967168 }
  0x27   :  { %1597 = dma.done.wait [#allocation4], 16  }
  0x28   :  { %1598 = vsyncadd [#allocation4], 4294967280 }
  0x29   :  { %52 = sfence }
  0x2a   :  { %v181_v0 = vld [vmem:[#allocation5] sm:$0xff]  ;;  %v187_v1 = vlaneseq  ;;  %v54_v2 = vld [vmem:[#allocation2 + $0x8] sm:$0xff]  ;;  %v56_v3 = vld [vmem:[#allocation2 + $0x18] sm:$0xff]  ;;  %v1604_v4 = vmov 1983009808   ;;  %s1605_s1 = smov 1  }
  0x2b   :  { %v185_v5 = vunpack.c.l.s4 %v1604_v4  ;;  %268 = vmatprep.mubr.f32.mxu0 %v54_v2  ;;  %493 = vmatprep.mubr.f32.mxu1 %v56_v3  ;;  %v183_v8 = vcombine.high %v181_v0, %v181_v0  ;;  %v53_v14 = vld [vmem:[#allocation2] sm:$0xff]  ;;  %v55_v15 = vld [vmem:[#allocation2 + $0x10] sm:$0xff]  ;;  %v58_v16 = vld [vmem:[#allocation2 + $0x28] sm:$0xff]  ;;  %s1403_s27 = sld [smem:[#allocation7 + $0x1]]  ;;  %s1606_s30 = smov 127  }
  0x2c   :  { %v188_v6 = vshrl.u32 %v187_v1, 7  ;;  %v60_v17 = vld [vmem:[#allocation2 + $0x38] sm:$0xff]  ;;  %v57_v18 = vld [vmem:[#allocation2 + $0x20] sm:$0xff]  ;;  %v59_v19 = vld [vmem:[#allocation2 + $0x30] sm:$0xff]  ;;  %s815_s28 = sld [smem:[#allocation7]] }
  0x2d   :  { %v186_v7 = vunpack.c.0.s8 %v185_v5  ;;  %v62_v20 = vld [vmem:[#allocation2 + $0x48] sm:$0xff]  ;;  %v64_v21 = vld [vmem:[#allocation2 + $0x58] sm:$0xff]  ;;  %v61_v22 = vld [vmem:[#allocation2 + $0x40] sm:$0xff] }
  0x2e   :  { %v63_v23 = vld [vmem:[#allocation2 + $0x50] sm:$0xff]  ;;  %v66_v24 = vld [vmem:[#allocation2 + $0x68] sm:$0xff]  ;;  %v68_v25 = vld [vmem:[#allocation2 + $0x78] sm:$0xff] }
  0x2f   :  { %v189_v9 = vsub.s32 %v186_v7, %v188_v6  ;;  %v65_v26 = vld [vmem:[#allocation2 + $0x60] sm:$0xff]  ;;  %v67_v27 = vld [vmem:[#allocation2 + $0x70] sm:$0xff]  ;;  %v70_v28 = vld [vmem:[#allocation2 + $0x88] sm:$0xff] }
  0x30   :  { %v72_v29 = vld [vmem:[#allocation2 + $0x98] sm:$0xff]  ;;  %v69_v30 = vld [vmem:[#allocation2 + $0x80] sm:$0xff]  ;;  %v71_v31 = vld [vmem:[#allocation2 + $0x90] sm:$0xff] }
  0x31   :  { %v190_v10 = vrot.slane %v181_v0, %v189_v9  ;;  %v197_v11 = vrot.slane %v183_v8, %v189_v9  ;;  %v74_v32 = vld [vmem:[#allocation2 + $0xa8] sm:$0xff]  ;;  %v76_v33 = vld [vmem:[#allocation2 + $0xb8] sm:$0xff]  ;;  %v73_v34 = vld [vmem:[#allocation2 + $0xa0] sm:$0xff] }
  0x32   :  { %v75_v35 = vld [vmem:[#allocation2 + $0xb0] sm:$0xff]  ;;  %v78_v36 = vld [vmem:[#allocation2 + $0xc8] sm:$0xff]  ;;  %v80_v37 = vld [vmem:[#allocation2 + $0xd8] sm:$0xff]  ;;  %s816_s29 = ssub.f32 %s1403_s27, %s815_s28 }
  0x33   :  { %v198_v12 = vcombine.high %v190_v10, %v190_v10  ;;  %v199_v13 = vcombine.high %v197_v11, %v197_v11  ;;  %v77_v38 = vld [vmem:[#allocation2 + $0xc0] sm:$0xff]  ;;  %v79_v39 = vld [vmem:[#allocation2 + $0xd0] sm:$0xff]  ;;  %v82_v40 = vld [vmem:[#allocation2 + $0xe8] sm:$0xff] }
  0x34   :  { %v84_v41 = vld [vmem:[#allocation2 + $0xf8] sm:$0xff]  ;;  %v81_v42 = vld [vmem:[#allocation2 + $0xe0] sm:$0xff]  ;;  %v83_v43 = vld [vmem:[#allocation2 + $0xf0] sm:$0xff] }
  0x35   :  { %234 = vmatprep.subr.mxu0 %v198_v12  ;;  %459 = vmatprep.subr.mxu1 %v199_v13  ;;  %v86_v44 = vld [vmem:[#allocation2 + $0x108] sm:$0xff]  ;;  %v88_v45 = vld [vmem:[#allocation2 + $0x118] sm:$0xff]  ;;  %v85_v46 = vld [vmem:[#allocation2 + $0x100] sm:$0xff] }
  0x36   :  { %235 = vmatpush1.xpose.msra.mxu0 %v190_v10  ;;  %460 = vmatpush1.xpose.msra.mxu1 %v197_v11  ;;  %v87_v47 = vld [vmem:[#allocation2 + $0x110] sm:$0xff]  ;;  %v90_v48 = vld [vmem:[#allocation2 + $0x128] sm:$0xff]  ;;  %v92_v49 = vld [vmem:[#allocation2 + $0x138] sm:$0xff] }
  0x37   :  { %v89_v50 = vld [vmem:[#allocation2 + $0x120] sm:$0xff]  ;;  %v91_v51 = vld [vmem:[#allocation2 + $0x130] sm:$0xff]  ;;  %v94_v52 = vld [vmem:[#allocation2 + $0x148] sm:$0xff] }
  0x38   :  { %v96_v53 = vld [vmem:[#allocation2 + $0x158] sm:$0xff]  ;;  %v93_v54 = vld [vmem:[#allocation2 + $0x140] sm:$0xff]  ;;  %v95_v55 = vld [vmem:[#allocation2 + $0x150] sm:$0xff] }
  0x39   :  { %269 = vmatmul.mubr.f32.vlgmr.msra.gmra.mxu0 %v53_v14  ;;  %494 = vmatmul.mubr.f32.vlgmr.msra.gmra.mxu1 %v55_v15  ;;  %v98_v56 = vld [vmem:[#allocation2 + $0x168] sm:$0xff]  ;;  %v100_v57 = vld [vmem:[#allocation2 + $0x178] sm:$0xff]  ;;  %v97_v58 = vld [vmem:[#allocation2 + $0x160] sm:$0xff] }
  0x3a   :  { %273 = vmatprep.mubr.f32.mxu0 %v58_v16  ;;  %498 = vmatprep.mubr.f32.mxu1 %v60_v17  ;;  %v99_v59 = vld [vmem:[#allocation2 + $0x170] sm:$0xff]  ;;  %v102_v60 = vld [vmem:[#allocation2 + $0x188] sm:$0xff]  ;;  %v104_v61 = vld [vmem:[#allocation2 + $0x198] sm:$0xff] }
  0x3b   :  { %v101_v62 = vld [vmem:[#allocation2 + $0x180] sm:$0xff]  ;;  %v103_v63 = vld [vmem:[#allocation2 + $0x190] sm:$0xff]  ;;  %v106_v0 = vld [vmem:[#allocation2 + $0x1a8] sm:$0xff] }
  0x3c   :  { %v108_v1 = vld [vmem:[#allocation2 + $0x1b8] sm:$0xff]  ;;  %v105_v2 = vld [vmem:[#allocation2 + $0x1a0] sm:$0xff]  ;;  %v107_v3 = vld [vmem:[#allocation2 + $0x1b0] sm:$0xff] }
  0x3d   :  { %274 = vmatmul.mubr.f32.gmra.mxu0 %v57_v18  ;;  %499 = vmatmul.mubr.f32.gmra.mxu1 %v59_v19  ;;  %v110_v4 = vld [vmem:[#allocation2 + $0x1c8] sm:$0xff]  ;;  %v112_v5 = vld [vmem:[#allocation2 + $0x1d8] sm:$0xff]  ;;  %v109_v6 = vld [vmem:[#allocation2 + $0x1c0] sm:$0xff] }
  0x3e   :  { %278 = vmatprep.mubr.f32.mxu0 %v62_v20  ;;  %503 = vmatprep.mubr.f32.mxu1 %v64_v21  ;;  %v111_v7 = vld [vmem:[#allocation2 + $0x1d0] sm:$0xff]  ;;  %v114_v8 = vld [vmem:[#allocation2 + $0x1e8] sm:$0xff]  ;;  %v116_v9 = vld [vmem:[#allocation2 + $0x1f8] sm:$0xff] }
  0x3f   :  { %v113_v10 = vld [vmem:[#allocation2 + $0x1e0] sm:$0xff]  ;;  %v115_v11 = vld [vmem:[#allocation2 + $0x1f0] sm:$0xff]  ;;  %v118_v12 = vld [vmem:[#allocation2 + $0x208] sm:$0xff] }
  0x40   :  { %v120_v13 = vld [vmem:[#allocation2 + $0x218] sm:$0xff]  ;;  %v117_v14 = vld [vmem:[#allocation2 + $0x200] sm:$0xff]  ;;  %v119_v15 = vld [vmem:[#allocation2 + $0x210] sm:$0xff] }
  0x41   :  { %279 = vmatmul.mubr.f32.gmra.mxu0 %v61_v22  ;;  %504 = vmatmul.mubr.f32.gmra.mxu1 %v63_v23  ;;  %v122_v16 = vld [vmem:[#allocation2 + $0x228] sm:$0xff]  ;;  %v124_v17 = vld [vmem:[#allocation2 + $0x238] sm:$0xff]  ;;  %v121_v18 = vld [vmem:[#allocation2 + $0x220] sm:$0xff] }
  0x42   :  { %283 = vmatprep.mubr.f32.mxu0 %v66_v24  ;;  %508 = vmatprep.mubr.f32.mxu1 %v68_v25  ;;  %v123_v19 = vld [vmem:[#allocation2 + $0x230] sm:$0xff]  ;;  %v126_v20 = vld [vmem:[#allocation2 + $0x248] sm:$0xff]  ;;  %v128_v21 = vld [vmem:[#allocation2 + $0x258] sm:$0xff] }
  0x43   :  { %v125_v22 = vld [vmem:[#allocation2 + $0x240] sm:$0xff]  ;;  %v127_v23 = vld [vmem:[#allocation2 + $0x250] sm:$0xff]  ;;  %v130_v24 = vld [vmem:[#allocation2 + $0x268] sm:$0xff] }
  0x44   :  { %v132_v25 = vld [vmem:[#allocation2 + $0x278] sm:$0xff] }
  0x45   :  { %284 = vmatmul.mubr.f32.gmra.mxu0 %v65_v26  ;;  %509 = vmatmul.mubr.f32.gmra.mxu1 %v67_v27  ;;  %v129_v26 = vld [vmem:[#allocation2 + $0x260] sm:$0xff]  ;;  %v131_v27 = vld [vmem:[#allocation2 + $0x270] sm:$0xff] }
  0x46   :  { %288 = vmatprep.mubr.f32.mxu0 %v70_v28  ;;  %513 = vmatprep.mubr.f32.mxu1 %v72_v29  ;;  %v134_v28 = vld [vmem:[#allocation2 + $0x288] sm:$0xff]  ;;  %v136_v29 = vld [vmem:[#allocation2 + $0x298] sm:$0xff] }
  0x49   :  { %289 = vmatmul.mubr.f32.gmra.mxu0 %v69_v30  ;;  %514 = vmatmul.mubr.f32.gmra.mxu1 %v71_v31  ;;  %v133_v30 = vld [vmem:[#allocation2 + $0x280] sm:$0xff]  ;;  %v135_v31 = vld [vmem:[#allocation2 + $0x290] sm:$0xff] }
  0x4a   :  { %293 = vmatprep.mubr.f32.mxu0 %v74_v32  ;;  %518 = vmatprep.mubr.f32.mxu1 %v76_v33  ;;  %v138_v32 = vld [vmem:[#allocation2 + $0x2a8] sm:$0xff]  ;;  %v140_v33 = vld [vmem:[#allocation2 + $0x2b8] sm:$0xff] }
  0x4d   :  { %294 = vmatmul.mubr.f32.gmra.mxu0 %v73_v34  ;;  %519 = vmatmul.mubr.f32.gmra.mxu1 %v75_v35  ;;  %v137_v34 = vld [vmem:[#allocation2 + $0x2a0] sm:$0xff]  ;;  %v139_v35 = vld [vmem:[#allocation2 + $0x2b0] sm:$0xff] }
  0x4e   :  { %298 = vmatprep.mubr.f32.mxu0 %v78_v36  ;;  %523 = vmatprep.mubr.f32.mxu1 %v80_v37  ;;  %v142_v36 = vld [vmem:[#allocation2 + $0x2c8] sm:$0xff]  ;;  %v144_v37 = vld [vmem:[#allocation2 + $0x2d8] sm:$0xff] }
  0x51   :  { %299 = vmatmul.mubr.f32.gmra.mxu0 %v77_v38  ;;  %524 = vmatmul.mubr.f32.gmra.mxu1 %v79_v39  ;;  %v141_v38 = vld [vmem:[#allocation2 + $0x2c0] sm:$0xff]  ;;  %v143_v39 = vld [vmem:[#allocation2 + $0x2d0] sm:$0xff] }
  0x52   :  { %303 = vmatprep.mubr.f32.mxu0 %v82_v40  ;;  %528 = vmatprep.mubr.f32.mxu1 %v84_v41  ;;  %v146_v40 = vld [vmem:[#allocation2 + $0x2e8] sm:$0xff]  ;;  %v148_v41 = vld [vmem:[#allocation2 + $0x2f8] sm:$0xff] }
  0x55   :  { %304 = vmatmul.mubr.f32.gmra.mxu0 %v81_v42  ;;  %529 = vmatmul.mubr.f32.gmra.mxu1 %v83_v43  ;;  %v145_v42 = vld [vmem:[#allocation2 + $0x2e0] sm:$0xff]  ;;  %v147_v43 = vld [vmem:[#allocation2 + $0x2f0] sm:$0xff] }
  0x56   :  { %308 = vmatprep.mubr.f32.mxu0 %v86_v44  ;;  %533 = vmatprep.mubr.f32.mxu1 %v88_v45  ;;  %v150_v44 = vld [vmem:[#allocation2 + $0x308] sm:$0xff]  ;;  %v152_v45 = vld [vmem:[#allocation2 + $0x318] sm:$0xff] }
  0x59   :  { %309 = vmatmul.mubr.f32.gmra.mxu0 %v85_v46  ;;  %534 = vmatmul.mubr.f32.gmra.mxu1 %v87_v47  ;;  %v149_v46 = vld [vmem:[#allocation2 + $0x300] sm:$0xff]  ;;  %v151_v47 = vld [vmem:[#allocation2 + $0x310] sm:$0xff] }
  0x5a   :  { %313 = vmatprep.mubr.f32.mxu0 %v90_v48  ;;  %538 = vmatprep.mubr.f32.mxu1 %v92_v49  ;;  %v154_v48 = vld [vmem:[#allocation2 + $0x328] sm:$0xff]  ;;  %v156_v49 = vld [vmem:[#allocation2 + $0x338] sm:$0xff] }
  0x5d   :  { %314 = vmatmul.mubr.f32.gmra.mxu0 %v89_v50  ;;  %539 = vmatmul.mubr.f32.gmra.mxu1 %v91_v51  ;;  %v153_v50 = vld [vmem:[#allocation2 + $0x320] sm:$0xff]  ;;  %v155_v51 = vld [vmem:[#allocation2 + $0x330] sm:$0xff] }
  0x5e   :  { %318 = vmatprep.mubr.f32.mxu0 %v94_v52  ;;  %543 = vmatprep.mubr.f32.mxu1 %v96_v53  ;;  %v158_v52 = vld [vmem:[#allocation2 + $0x348] sm:$0xff]  ;;  %v160_v53 = vld [vmem:[#allocation2 + $0x358] sm:$0xff] }
  0x61   :  { %319 = vmatmul.mubr.f32.gmra.mxu0 %v93_v54  ;;  %544 = vmatmul.mubr.f32.gmra.mxu1 %v95_v55  ;;  %v157_v54 = vld [vmem:[#allocation2 + $0x340] sm:$0xff]  ;;  %v159_v55 = vld [vmem:[#allocation2 + $0x350] sm:$0xff] }
  0x62   :  { %323 = vmatprep.mubr.f32.mxu0 %v98_v56  ;;  %548 = vmatprep.mubr.f32.mxu1 %v100_v57  ;;  %v162_v56 = vld [vmem:[#allocation2 + $0x368] sm:$0xff]  ;;  %v164_v57 = vld [vmem:[#allocation2 + $0x378] sm:$0xff] }
  0x65   :  { %324 = vmatmul.mubr.f32.gmra.mxu0 %v97_v58  ;;  %549 = vmatmul.mubr.f32.gmra.mxu1 %v99_v59  ;;  %v161_v58 = vld [vmem:[#allocation2 + $0x360] sm:$0xff]  ;;  %v163_v59 = vld [vmem:[#allocation2 + $0x370] sm:$0xff] }
  0x66   :  { %328 = vmatprep.mubr.f32.mxu0 %v102_v60  ;;  %553 = vmatprep.mubr.f32.mxu1 %v104_v61  ;;  %v166_v60 = vld [vmem:[#allocation2 + $0x388] sm:$0xff]  ;;  %v168_v61 = vld [vmem:[#allocation2 + $0x398] sm:$0xff] }
  0x69   :  { %329 = vmatmul.mubr.f32.gmra.mxu0 %v101_v62  ;;  %554 = vmatmul.mubr.f32.gmra.mxu1 %v103_v63  ;;  %v165_v62 = vld [vmem:[#allocation2 + $0x380] sm:$0xff]  ;;  %v167_v63 = vld [vmem:[#allocation2 + $0x390] sm:$0xff] }
  0x6a   :  { %333 = vmatprep.mubr.f32.mxu0 %v106_v0  ;;  %558 = vmatprep.mubr.f32.mxu1 %v108_v1  ;;  %v170_v0 = vld [vmem:[#allocation2 + $0x3a8] sm:$0xff]  ;;  %v172_v1 = vld [vmem:[#allocation2 + $0x3b8] sm:$0xff] }
  0x6d   :  { %334 = vmatmul.mubr.f32.gmra.mxu0 %v105_v2  ;;  %559 = vmatmul.mubr.f32.gmra.mxu1 %v107_v3  ;;  %v169_v2 = vld [vmem:[#allocation2 + $0x3a0] sm:$0xff]  ;;  %v171_v3 = vld [vmem:[#allocation2 + $0x3b0] sm:$0xff] }
  0x6e   :  { %338 = vmatprep.mubr.f32.mxu0 %v110_v4  ;;  %563 = vmatprep.mubr.f32.mxu1 %v112_v5  ;;  %v174_v4 = vld [vmem:[#allocation2 + $0x3c8] sm:$0xff]  ;;  %v176_v5 = vld [vmem:[#allocation2 + $0x3d8] sm:$0xff] }
  0x71   :  { %339 = vmatmul.mubr.f32.gmra.mxu0 %v109_v6  ;;  %564 = vmatmul.mubr.f32.gmra.mxu1 %v111_v7  ;;  %v173_v6 = vld [vmem:[#allocation2 + $0x3c0] sm:$0xff]  ;;  %v175_v7 = vld [vmem:[#allocation2 + $0x3d0] sm:$0xff] }
  0x72   :  { %343 = vmatprep.mubr.f32.mxu0 %v114_v8  ;;  %568 = vmatprep.mubr.f32.mxu1 %v116_v9  ;;  %v178_v8 = vld [vmem:[#allocation2 + $0x3e8] sm:$0xff]  ;;  %v180_v9 = vld [vmem:[#allocation2 + $0x3f8] sm:$0xff] }
  0x75   :  { %344 = vmatmul.mubr.f32.gmra.mxu0 %v113_v10  ;;  %569 = vmatmul.mubr.f32.gmra.mxu1 %v115_v11  ;;  %v177_v10 = vld [vmem:[#allocation2 + $0x3e0] sm:$0xff]  ;;  %v179_v11 = vld [vmem:[#allocation2 + $0x3f0] sm:$0xff] }
  0x76   :  { %348 = vmatprep.mubr.f32.mxu0 %v118_v12  ;;  %573 = vmatprep.mubr.f32.mxu1 %v120_v13 }
  0x79   :  { %349 = vmatmul.mubr.f32.gmra.mxu0 %v117_v14  ;;  %574 = vmatmul.mubr.f32.gmra.mxu1 %v119_v15 }
  0x7a   :  { %353 = vmatprep.mubr.f32.mxu0 %v122_v16  ;;  %578 = vmatprep.mubr.f32.mxu1 %v124_v17 }
  0x7d   :  { %354 = vmatmul.mubr.f32.gmra.mxu0 %v121_v18  ;;  %579 = vmatmul.mubr.f32.gmra.mxu1 %v123_v19 }
  0x7e   :  { %358 = vmatprep.mubr.f32.mxu0 %v126_v20  ;;  %583 = vmatprep.mubr.f32.mxu1 %v128_v21 }
  0x81   :  { %359 = vmatmul.mubr.f32.gmra.mxu0 %v125_v22  ;;  %584 = vmatmul.mubr.f32.gmra.mxu1 %v127_v23 }
  0x82   :  { %363 = vmatprep.mubr.f32.mxu0 %v130_v24  ;;  %588 = vmatprep.mubr.f32.mxu1 %v132_v25 }
  0x85   :  { %364 = vmatmul.mubr.f32.gmra.mxu0 %v129_v26  ;;  %589 = vmatmul.mubr.f32.gmra.mxu1 %v131_v27 }
  0x86   :  { %368 = vmatprep.mubr.f32.mxu0 %v134_v28  ;;  %593 = vmatprep.mubr.f32.mxu1 %v136_v29 }
  0x89   :  { %369 = vmatmul.mubr.f32.gmra.mxu0 %v133_v30  ;;  %594 = vmatmul.mubr.f32.gmra.mxu1 %v135_v31 }
  0x8a   :  { %373 = vmatprep.mubr.f32.mxu0 %v138_v32  ;;  %598 = vmatprep.mubr.f32.mxu1 %v140_v33 }
  0x8d   :  { %374 = vmatmul.mubr.f32.gmra.mxu0 %v137_v34  ;;  %599 = vmatmul.mubr.f32.gmra.mxu1 %v139_v35 }
  0x8e   :  { %378 = vmatprep.mubr.f32.mxu0 %v142_v36  ;;  %603 = vmatprep.mubr.f32.mxu1 %v144_v37 }
  0x91   :  { %379 = vmatmul.mubr.f32.gmra.mxu0 %v141_v38  ;;  %604 = vmatmul.mubr.f32.gmra.mxu1 %v143_v39 }
  0x92   :  { %383 = vmatprep.mubr.f32.mxu0 %v146_v40  ;;  %608 = vmatprep.mubr.f32.mxu1 %v148_v41 }
  0x95   :  { %384 = vmatmul.mubr.f32.gmra.mxu0 %v145_v42  ;;  %609 = vmatmul.mubr.f32.gmra.mxu1 %v147_v43 }
  0x96   :  { %388 = vmatprep.mubr.f32.mxu0 %v150_v44  ;;  %613 = vmatprep.mubr.f32.mxu1 %v152_v45 }
  0x99   :  { %389 = vmatmul.mubr.f32.gmra.mxu0 %v149_v46  ;;  %614 = vmatmul.mubr.f32.gmra.mxu1 %v151_v47 }
  0x9a   :  { %393 = vmatprep.mubr.f32.mxu0 %v154_v48  ;;  %618 = vmatprep.mubr.f32.mxu1 %v156_v49 }
  0x9d   :  { %394 = vmatmul.mubr.f32.gmra.mxu0 %v153_v50  ;;  %619 = vmatmul.mubr.f32.gmra.mxu1 %v155_v51 }
  0x9e   :  { %398 = vmatprep.mubr.f32.mxu0 %v158_v52  ;;  %623 = vmatprep.mubr.f32.mxu1 %v160_v53 }
  0xa1   :  { %399 = vmatmul.mubr.f32.gmra.mxu0 %v157_v54  ;;  %624 = vmatmul.mubr.f32.gmra.mxu1 %v159_v55 }
  0xa2   :  { %403 = vmatprep.mubr.f32.mxu0 %v162_v56  ;;  %628 = vmatprep.mubr.f32.mxu1 %v164_v57 }
  0xa5   :  { %404 = vmatmul.mubr.f32.gmra.mxu0 %v161_v58  ;;  %629 = vmatmul.mubr.f32.gmra.mxu1 %v163_v59 }
  0xa6   :  { %408 = vmatprep.mubr.f32.mxu0 %v166_v60  ;;  %633 = vmatprep.mubr.f32.mxu1 %v168_v61 }
  0xa9   :  { %409 = vmatmul.mubr.f32.gmra.mxu0 %v165_v62  ;;  %634 = vmatmul.mubr.f32.gmra.mxu1 %v167_v63 }
  0xaa   :  { %413 = vmatprep.mubr.f32.mxu0 %v170_v0  ;;  %638 = vmatprep.mubr.f32.mxu1 %v172_v1 }
  0xad   :  { %414 = vmatmul.mubr.f32.gmra.mxu0 %v169_v2  ;;  %639 = vmatmul.mubr.f32.gmra.mxu1 %v171_v3 }
  0xae   :  { %418 = vmatprep.mubr.f32.mxu0 %v174_v4  ;;  %643 = vmatprep.mubr.f32.mxu1 %v176_v5 }
  0xb1   :  { %419 = vmatmul.mubr.f32.gmra.mxu0 %v173_v6  ;;  %644 = vmatmul.mubr.f32.gmra.mxu1 %v175_v7 }
  0xb2   :  { %423 = vmatprep.mubr.f32.mxu0 %v178_v8  ;;  %648 = vmatprep.mubr.f32.mxu1 %v180_v9 }
  0xb5   :  { %424 = vmatmul.mubr.f32.gmra.mxu0 %v177_v10  ;;  %649 = vmatmul.mubr.f32.gmra.mxu1 %v179_v11 }
  0xf9   :  { %v270_v12 = vpop.f32.mrf.mxu0  ;;  %v495_v13 = vpop.f32.mrf.mxu1 }
  0xfa   :  { %v1636_v14 = vadd.f32 %v495_v13, %v270_v12 }
  0xfb   :  { %v272_v15 = vpop.f32.mrf.mxu0  ;;  %v497_v16 = vpop.f32.mrf.mxu1 }
  0xfc   :  { %686 = vrot.lane.b32.xlu0 %v1636_v14, %s1605_s1 }
  0xfd   :  { %v275_v17 = vpop.f32.mrf.mxu0  ;;  %v500_v18 = vpop.f32.mrf.mxu1 }
  0xfe   :  { %v1640_v19 = vadd.f32 %v500_v18, %v275_v17 }
  0xff   :  { %v277_v20 = vpop.f32.mrf.mxu0  ;;  %v502_v21 = vpop.f32.mrf.mxu1 }
 0x100   :  { %688 = vrot.lane.b32.xlu0 %v1640_v19, %s1605_s1 }
 0x101   :  { %v280_v22 = vpop.f32.mrf.mxu0  ;;  %v505_v23 = vpop.f32.mrf.mxu1 }
 0x102   :  { %v1644_v24 = vadd.f32 %v505_v23, %v280_v22 }
 0x103   :  { %v282_v25 = vpop.f32.mrf.mxu0  ;;  %v507_v26 = vpop.f32.mrf.mxu1 }
 0x104   :  { %690 = vrot.lane.b32.xlu1 %v1644_v24, %s1605_s1 }
 0x105   :  { %v285_v27 = vpop.f32.mrf.mxu0  ;;  %v510_v28 = vpop.f32.mrf.mxu1 }
 0x106   :  { %v1648_v29 = vadd.f32 %v510_v28, %v285_v27 }
 0x107   :  { %v287_v30 = vpop.f32.mrf.mxu0  ;;  %v512_v31 = vpop.f32.mrf.mxu1 }
 0x108   :  { %692 = vrot.lane.b32.xlu1 %v1648_v29, %s1605_s1 }
 0x109   :  { %v290_v32 = vpop.f32.mrf.mxu0  ;;  %v515_v33 = vpop.f32.mrf.mxu1 }
 0x10a   :  { %v1652_v34 = vadd.f32 %v515_v33, %v290_v32 }
 0x10b   :  { %v292_v35 = vpop.f32.mrf.mxu0  ;;  %v517_v36 = vpop.f32.mrf.mxu1 }
 0x10c   :  { %694 = vrot.lane.b32.xlu0 %v1652_v34, %s1605_s1 }
 0x10d   :  { %v295_v37 = vpop.f32.mrf.mxu0  ;;  %v520_v38 = vpop.f32.mrf.mxu1 }
 0x10e   :  { %v1656_v39 = vadd.f32 %v520_v38, %v295_v37 }
 0x10f   :  { %v297_v40 = vpop.f32.mrf.mxu0  ;;  %v522_v41 = vpop.f32.mrf.mxu1 }
 0x110   :  { %696 = vrot.lane.b32.xlu1 %v1656_v39, %s1605_s1 }
 0x111   :  { %v300_v42 = vpop.f32.mrf.mxu0  ;;  %v525_v43 = vpop.f32.mrf.mxu1 }
 0x112   :  { %v1660_v44 = vadd.f32 %v525_v43, %v300_v42 }
 0x113   :  { %v302_v45 = vpop.f32.mrf.mxu0  ;;  %v527_v46 = vpop.f32.mrf.mxu1 }
 0x114   :  { %698 = vrot.lane.b32.xlu0 %v1660_v44, %s1605_s1 }
 0x115   :  { %v305_v47 = vpop.f32.mrf.mxu0  ;;  %v530_v48 = vpop.f32.mrf.mxu1 }
 0x116   :  { %v1664_v49 = vadd.f32 %v530_v48, %v305_v47 }
 0x117   :  { %v307_v50 = vpop.f32.mrf.mxu0  ;;  %v532_v51 = vpop.f32.mrf.mxu1 }
 0x118   :  { %700 = vrot.lane.b32.xlu1 %v1664_v49, %s1605_s1 }
 0x119   :  { %v310_v52 = vpop.f32.mrf.mxu0  ;;  %v535_v53 = vpop.f32.mrf.mxu1 }
 0x11a   :  { %v1668_v54 = vadd.f32 %v535_v53, %v310_v52 }
 0x11b   :  { %v312_v55 = vpop.f32.mrf.mxu0  ;;  %v537_v56 = vpop.f32.mrf.mxu1 }
 0x11c   :  { %702 = vrot.lane.b32.xlu0 %v1668_v54, %s1605_s1 }
 0x11d   :  { %v315_v57 = vpop.f32.mrf.mxu0  ;;  %v540_v58 = vpop.f32.mrf.mxu1 }
 0x11e   :  { %v1672_v59 = vadd.f32 %v540_v58, %v315_v57 }
 0x11f   :  { %v317_v60 = vpop.f32.mrf.mxu0  ;;  %v542_v61 = vpop.f32.mrf.mxu1 }
 0x120   :  { %704 = vrot.lane.b32.xlu1 %v1672_v59, %s1605_s1 }
 0x121   :  { %v320_v62 = vpop.f32.mrf.mxu0  ;;  %v545_v63 = vpop.f32.mrf.mxu1 }
 0x122   :  { %v1676_v0 = vadd.f32 %v545_v63, %v320_v62 }
 0x123   :  { %v322_v1 = vpop.f32.mrf.mxu0  ;;  %v547_v2 = vpop.f32.mrf.mxu1 }
 0x124   :  { %706 = vrot.lane.b32.xlu0 %v1676_v0, %s1605_s1 }
 0x125   :  { %v325_v3 = vpop.f32.mrf.mxu0  ;;  %v550_v4 = vpop.f32.mrf.mxu1 }
 0x126   :  { %v1680_v5 = vadd.f32 %v550_v4, %v325_v3 }
 0x127   :  { %v327_v6 = vpop.f32.mrf.mxu0  ;;  %v552_v7 = vpop.f32.mrf.mxu1 }
 0x128   :  { %708 = vrot.lane.b32.xlu1 %v1680_v5, %s1605_s1 }
 0x129   :  { %v330_v8 = vpop.f32.mrf.mxu0  ;;  %v555_v9 = vpop.f32.mrf.mxu1 }
 0x12a   :  { %v1684_v10 = vadd.f32 %v555_v9, %v330_v8 }
 0x12b   :  { %v332_v11 = vpop.f32.mrf.mxu0  ;;  %v557_v12 = vpop.f32.mrf.mxu1 }
 0x12c   :  { %710 = vrot.lane.b32.xlu0 %v1684_v10, %s1605_s1 }
 0x12d   :  { %v335_v13 = vpop.f32.mrf.mxu0  ;;  %v560_v15 = vpop.f32.mrf.mxu1 }
 0x12e   :  { %v1688_v16 = vadd.f32 %v560_v15, %v335_v13 }
 0x12f   :  { %v337_v17 = vpop.f32.mrf.mxu0  ;;  %v562_v18 = vpop.f32.mrf.mxu1 }
 0x130   :  { %712 = vrot.lane.b32.xlu1 %v1688_v16, %s1605_s1 }
 0x131   :  { %v340_v20 = vpop.f32.mrf.mxu0  ;;  %v565_v21 = vpop.f32.mrf.mxu1 }
 0x132   :  { %v1692_v22 = vadd.f32 %v565_v21, %v340_v20 }
 0x133   :  { %v342_v23 = vpop.f32.mrf.mxu0  ;;  %v567_v25 = vpop.f32.mrf.mxu1 }
 0x134   :  { %714 = vrot.lane.b32.xlu0 %v1692_v22, %s1605_s1 }
 0x135   :  { %v345_v26 = vpop.f32.mrf.mxu0  ;;  %v570_v27 = vpop.f32.mrf.mxu1 }
 0x136   :  { %v1696_v28 = vadd.f32 %v570_v27, %v345_v26 }
 0x137   :  { %v347_v30 = vpop.f32.mrf.mxu0  ;;  %v572_v31 = vpop.f32.mrf.mxu1 }
 0x138   :  { %716 = vrot.lane.b32.xlu1 %v1696_v28, %s1605_s1 }
 0x139   :  { %v350_v32 = vpop.f32.mrf.mxu0  ;;  %v575_v33 = vpop.f32.mrf.mxu1 }
 0x13a   :  { %v1700_v35 = vadd.f32 %v575_v33, %v350_v32 }
 0x13b   :  { %v352_v36 = vpop.f32.mrf.mxu0  ;;  %v577_v37 = vpop.f32.mrf.mxu1 }
 0x13c   :  { %718 = vrot.lane.b32.xlu0 %v1700_v35, %s1605_s1 }
 0x13d   :  { %v355_v38 = vpop.f32.mrf.mxu0  ;;  %v580_v40 = vpop.f32.mrf.mxu1 }
 0x13e   :  { %v1704_v41 = vadd.f32 %v580_v40, %v355_v38 }
 0x13f   :  { %v357_v42 = vpop.f32.mrf.mxu0  ;;  %v582_v43 = vpop.f32.mrf.mxu1 }
 0x140   :  { %720 = vrot.lane.b32.xlu1 %v1704_v41, %s1605_s1 }
 0x141   :  { %v360_v45 = vpop.f32.mrf.mxu0  ;;  %v585_v46 = vpop.f32.mrf.mxu1 }
 0x142   :  { %v1708_v47 = vadd.f32 %v585_v46, %v360_v45 }
 0x143   :  { %v362_v48 = vpop.f32.mrf.mxu0  ;;  %v587_v50 = vpop.f32.mrf.mxu1 }
 0x144   :  { %722 = vrot.lane.b32.xlu0 %v1708_v47, %s1605_s1 }
 0x145   :  { %v365_v51 = vpop.f32.mrf.mxu0  ;;  %v590_v52 = vpop.f32.mrf.mxu1 }
 0x146   :  { %v1712_v53 = vadd.f32 %v590_v52, %v365_v51 }
 0x147   :  { %v367_v55 = vpop.f32.mrf.mxu0  ;;  %v592_v56 = vpop.f32.mrf.mxu1 }
 0x148   :  { %724 = vrot.lane.b32.xlu1 %v1712_v53, %s1605_s1 }
 0x149   :  { %v370_v57 = vpop.f32.mrf.mxu0  ;;  %v595_v58 = vpop.f32.mrf.mxu1 }
 0x14a   :  { %v1716_v60 = vadd.f32 %v595_v58, %v370_v57 }
 0x14b   :  { %v372_v61 = vpop.f32.mrf.mxu0  ;;  %v597_v62 = vpop.f32.mrf.mxu1 }
 0x14c   :  { %726 = vrot.lane.b32.xlu0 %v1716_v60, %s1605_s1 }
 0x14d   :  { %v375_v63 = vpop.f32.mrf.mxu0  ;;  %v600_v1 = vpop.f32.mrf.mxu1 }
 0x14e   :  { %v1720_v2 = vadd.f32 %v600_v1, %v375_v63  ;;  %v1754_v63 = vstv %s816_s29 }
 0x14f   :  { %v377_v3 = vpop.f32.mrf.mxu0  ;;  %v602_v4 = vpop.f32.mrf.mxu1 }
 0x150   :  { %728 = vrot.lane.b32.xlu1 %v1720_v2, %s1605_s1 }
 0x151   :  { %v380_v6 = vpop.f32.mrf.mxu0  ;;  %v605_v7 = vpop.f32.mrf.mxu1 }
 0x152   :  { %v1724_v8 = vadd.f32 %v605_v7, %v380_v6 }
 0x153   :  { %v382_v9 = vpop.f32.mrf.mxu0  ;;  %v607_v11 = vpop.f32.mrf.mxu1 }
 0x154   :  { %730 = vrot.lane.b32.xlu0 %v1724_v8, %s1605_s1 }
 0x155   :  { %v385_v12 = vpop.f32.mrf.mxu0  ;;  %v610_v13 = vpop.f32.mrf.mxu1 }
 0x156   :  { %v1728_v15 = vadd.f32 %v610_v13, %v385_v12 }
 0x157   :  { %v387_v17 = vpop.f32.mrf.mxu0  ;;  %v612_v18 = vpop.f32.mrf.mxu1 }
 0x158   :  { %732 = vrot.lane.b32.xlu1 %v1728_v15, %s1605_s1 }
 0x159   :  { %v390_v20 = vpop.f32.mrf.mxu0  ;;  %v615_v21 = vpop.f32.mrf.mxu1 }
 0x15a   :  { %v1732_v23 = vadd.f32 %v615_v21, %v390_v20 }
 0x15b   :  { %v392_v25 = vpop.f32.mrf.mxu0  ;;  %v617_v26 = vpop.f32.mrf.mxu1 }
 0x15c   :  { %734 = vrot.lane.b32.xlu0 %v1732_v23, %s1605_s1 }
 0x15d   :  { %v395_v27 = vpop.f32.mrf.mxu0  ;;  %v620_v30 = vpop.f32.mrf.mxu1 }
 0x15e   :  { %v1736_v31 = vadd.f32 %v620_v30, %v395_v27 }
 0x15f   :  { %v397_v32 = vpop.f32.mrf.mxu0  ;;  %v622_v33 = vpop.f32.mrf.mxu1 }
 0x160   :  { %736 = vrot.lane.b32.xlu1 %v1736_v31, %s1605_s1 }
 0x161   :  { %v400_v36 = vpop.f32.mrf.mxu0  ;;  %v625_v37 = vpop.f32.mrf.mxu1 }
 0x162   :  { %v1740_v38 = vadd.f32 %v625_v37, %v400_v36 }
 0x163   :  { %v402_v40 = vpop.f32.mrf.mxu0  ;;  %v627_v42 = vpop.f32.mrf.mxu1 }
 0x164   :  { %738 = vrot.lane.b32.xlu0 %v1740_v38, %s1605_s1 }
 0x165   :  { %v405_v43 = vpop.f32.mrf.mxu0  ;;  %v630_v45 = vpop.f32.mrf.mxu1 }
 0x166   :  { %v1744_v46 = vadd.f32 %v630_v45, %v405_v43 }
 0x167   :  { %v407_v48 = vpop.f32.mrf.mxu0  ;;  %v632_v50 = vpop.f32.mrf.mxu1 }
 0x168   :  { %740 = vrot.lane.b32.xlu1 %v1744_v46, %s1605_s1 }
 0x169   :  { %v410_v51 = vpop.f32.mrf.mxu0  ;;  %v635_v52 = vpop.f32.mrf.mxu1 }
 0x16a   :  { %v1748_v55 = vadd.f32 %v635_v52, %v410_v51 }
 0x16b   :  { %v412_v56 = vpop.f32.mrf.mxu0  ;;  %v637_v57 = vpop.f32.mrf.mxu1 }
 0x16c   :  { %742 = vrot.lane.b32.xlu0 %v1748_v55, %s1605_s1 }
 0x16d   :  { %v415_v58 = vpop.f32.mrf.mxu0  ;;  %v640_v61 = vpop.f32.mrf.mxu1 }
 0x16e   :  { %v1752_v62 = vadd.f32 %v640_v61, %v415_v58  ;;  %v687_v1 = vpop.permute.xlu0 %686 }
 0x16f   :  { %v782_v3 = vsub.f32 %v1636_v14, %v687_v1  ;;  %v417_v4 = vpop.f32.mrf.mxu0  ;;  %v642_v6 = vpop.f32.mrf.mxu1 }
 0x170   :  { %744 = vrot.lane.b32.xlu1 %v1752_v62, %s1605_s1 }
 0x171   :  { %v1760_v7 = vadd.f32 %v1754_v63, %v782_v3  ;;  %v420_v9 = vpop.f32.mrf.mxu0  ;;  %v645_v11 = vpop.f32.mrf.mxu1 }
 0x172   :  { %v1762_v12 = vadd.f32 %v645_v11, %v420_v9  ;;  %v689_v13 = vpop.permute.xlu0 %688 }
 0x173   :  { %v850_v17 = vand.u32 2147483647, %v1760_v7  ;;  %v783_v18 = vsub.f32 %v1640_v19, %v689_v13  ;;  %v422_v20 = vpop.f32.mrf.mxu0  ;;  %v647_v21 = vpop.f32.mrf.mxu1  ;;  %vm1106_vm0 = vcmp.ge.f32.partialorder %v1760_v7, 0.0 }
 0x174   :  { %746 = vrot.lane.b32.xlu0 %v1762_v12, %s1605_s1 }
 0x175   :  { %v882_v14 = vsub.f32 0.0, %v850_v17  ;;  %v1769_v25 = vadd.f32 %v1754_v63, %v783_v18  ;;  %v425_v26 = vpop.f32.mrf.mxu0  ;;  %v650_v27 = vpop.f32.mrf.mxu1 }
 0x176   :  { %v1771_v30 = vadd.f32 %v650_v27, %v425_v26  ;;  %v691_v32 = vpop.permute.xlu1 %690 }
 0x177   :  { %v914_v33 = vmul.f32 1.442695, %v882_v14  ;;  %v851_v36 = vand.u32 2147483647, %v1769_v25  ;;  %v784_v37 = vsub.f32 %v1644_v24, %v691_v32  ;;  %v427_v19 = vpop.f32.mrf.mxu0  ;;  %v652_v40 = vpop.f32.mrf.mxu1  ;;  %vm1107_vm1 = vcmp.ge.f32.partialorder %v1769_v25, 0.0 }
 0x178   :  { %748 = vrot.lane.b32.xlu1 %v1771_v30, %s1605_s1 }
 0x179   :  { %1413 = vpow2.f32 %v914_v33  ;;  %v883_v42 = vsub.f32 0.0, %v851_v36  ;;  %v1778_v43 = vadd.f32 %v1754_v63, %v784_v37 }
 0x17a   :  { %v693_v45 = vpop.permute.xlu1 %692 }
 0x17b   :  { %v916_v48 = vmul.f32 1.442695, %v883_v42  ;;  %v852_v50 = vand.u32 2147483647, %v1778_v43  ;;  %v785_v51 = vsub.f32 %v1648_v29, %v693_v45  ;;  %vm1108_vm2 = vcmp.ge.f32.partialorder %v1778_v43, 0.0 }
 0x17d   :  { %1415 = vpow2.f32 %v916_v48  ;;  %v884_v52 = vsub.f32 0.0, %v852_v50  ;;  %v1783_v24 = vadd.f32 %v1754_v63, %v785_v51 }
 0x17e   :  { %v695_v56 = vpop.permute.xlu0 %694 }
 0x17f   :  { %v918_v57 = vmul.f32 1.442695, %v884_v52  ;;  %v853_v58 = vand.u32 2147483647, %v1783_v24  ;;  %v786_v61 = vsub.f32 %v1652_v34, %v695_v56  ;;  %vm1109_vm3 = vcmp.ge.f32.partialorder %v1783_v24, 0.0 }
 0x181   :  { %1417 = vpow2.f32 %v918_v57  ;;  %v885_v1 = vsub.f32 0.0, %v853_v58  ;;  %v1788_v3 = vadd.f32 %v1754_v63, %v786_v61 }
 0x182   :  { %v697_v4 = vpop.permute.xlu1 %696 }
 0x183   :  { %v920_v6 = vmul.f32 1.442695, %v885_v1  ;;  %v854_v29 = vand.u32 2147483647, %v1788_v3  ;;  %v787_v9 = vsub.f32 %v1656_v39, %v697_v4  ;;  %vm1110_vm4 = vcmp.ge.f32.partialorder %v1788_v3, 0.0 }
 0x185   :  { %1419 = vpow2.f32 %v920_v6  ;;  %v886_v11 = vsub.f32 0.0, %v854_v29  ;;  %v1793_v13 = vadd.f32 %v1754_v63, %v787_v9 }
 0x186   :  { %v1414_v17 = vpop.eup %1413  ;;  %v699_v18 = vpop.permute.xlu0 %698 }
 0x187   :  { %v978_v20 = vadd.f32 1.0, %v1414_v17  ;;  %v922_v34 = vmul.f32 1.442695, %v886_v11  ;;  %v855_v21 = vand.u32 2147483647, %v1793_v13  ;;  %v788_v14 = vsub.f32 %v1660_v44, %v699_v18 }
 0x188   :  { %vm1111_vm5 = vcmp.ge.f32.partialorder %v1793_v13, 0.0 }
 0x189   :  { %1421 = vrcp.f32 %v978_v20  ;;  %v887_v26 = vsub.f32 0.0, %v855_v21  ;;  %v1798_v27 = vadd.f32 %v1754_v63, %v788_v14 }
 0x18a   :  { %v1416_v32 = vpop.eup %1415  ;;  %1423 = vpow2.f32 %v922_v34  ;;  %v701_v39 = vpop.permute.xlu1 %700 }
 0x18b   :  { %v979_v33 = vadd.f32 1.0, %v1416_v32  ;;  %v924_v36 = vmul.f32 1.442695, %v887_v26  ;;  %v856_v37 = vand.u32 2147483647, %v1798_v27  ;;  %v789_v19 = vsub.f32 %v1664_v49, %v701_v39 }
 0x18c   :  { %vm1112_vm6 = vcmp.ge.f32.partialorder %v1798_v27, 0.0 }
 0x18d   :  { %1425 = vrcp.f32 %v979_v33  ;;  %v888_v40 = vsub.f32 0.0, %v856_v37  ;;  %v1803_v42 = vadd.f32 %v1754_v63, %v789_v19 }
 0x18e   :  { %v1418_v44 = vpop.eup %1417  ;;  %1427 = vpow2.f32 %v924_v36  ;;  %v703_v45 = vpop.permute.xlu0 %702 }
 0x18f   :  { %v980_v48 = vadd.f32 1.0, %v1418_v44  ;;  %v926_v50 = vmul.f32 1.442695, %v888_v40  ;;  %v857_v51 = vand.u32 2147483647, %v1803_v42  ;;  %v790_v52 = vsub.f32 %v1668_v54, %v703_v45 }
 0x190   :  { %vm1113_vm7 = vcmp.ge.f32.partialorder %v1803_v42, 0.0 }
 0x191   :  { %1429 = vrcp.f32 %v980_v48  ;;  %v889_v56 = vsub.f32 0.0, %v857_v51  ;;  %v1808_v57 = vadd.f32 %v1754_v63, %v790_v52 }
 0x192   :  { %v1810_v49 = vpop.eup %1419  ;;  %1431 = vpow2.f32 %v926_v50  ;;  %v705_v58 = vpop.permute.xlu1 %704 }
 0x193   :  { %v981_v61 = vadd.f32 1.0, %v1810_v49  ;;  %v928_v1 = vmul.f32 1.442695, %v889_v56  ;;  %v858_v4 = vand.u32 2147483647, %v1808_v57  ;;  %v791_v6 = vsub.f32 %v1672_v59, %v705_v58 }
 0x194   :  { %vm1114_vm8 = vcmp.ge.f32.partialorder %v1808_v57, 0.0 }
 0x195   :  { %1433 = vrcp.f32 %v981_v61  ;;  %v890_v29 = vsub.f32 0.0, %v858_v4  ;;  %v1816_v54 = vadd.f32 %v1754_v63, %v791_v6 }
 0x196   :  { %v1422_v9 = vpop.eup %1421  ;;  %1435 = vpow2.f32 %v928_v1  ;;  %v707_v11 = vpop.permute.xlu0 %706 }
 0x197   :  { %v1818_v18 = vpop.eup %1423  ;;  %v930_v20 = vmul.f32 1.442695, %v890_v29  ;;  %v859_v34 = vand.u32 2147483647, %v1816_v54  ;;  %v792_v21 = vsub.f32 %v1676_v0, %v707_v11  ;;  %v1074_v14 = vmul.f32 %v1422_v9, %v1414_v17 }
 0x198   :  { %v982_v26 = vadd.f32 1.0, %v1818_v18  ;;  %vm1115_vm9 = vcmp.ge.f32.partialorder %v1816_v54, 0.0 }
 0x199   :  { %1437 = vpow2.f32 %v930_v20  ;;  %v891_v59 = vsub.f32 0.0, %v859_v34  ;;  %v1825_v39 = vadd.f32 %v1754_v63, %v792_v21  ;;  %v1138_v33 = vsel %vm1106_vm0, %v1074_v14, %v1422_v9 }
 0x19a   :  { %v1426_v36 = vpop.eup %1425  ;;  %1439 = vrcp.f32 %v982_v26  ;;  %v709_v37 = vpop.permute.xlu1 %708  ;;  %1202 = vrot.lane.b32.xlu0 %v1138_v33, %s1606_s30  ;;  %v1828_v19 = vsel %vm1106_vm0, %v1422_v9, %v1074_v14 }
 0x19b   :  { %v1830_v0 = vpop.eup %1427  ;;  %v932_v17 = vmul.f32 1.442695, %v891_v59  ;;  %v860_v40 = vand.u32 2147483647, %v1825_v39  ;;  %v793_v7 = vsub.f32 %v1680_v5, %v709_v37  ;;  %v1075_v45 = vmul.f32 %v1426_v36, %v1416_v32 }
 0x19c   :  { %v983_v48 = vadd.f32 1.0, %v1830_v0  ;;  %vm1116_vm10 = vcmp.ge.f32.partialorder %v1825_v39, 0.0 }
 0x19d   :  { %1441 = vpow2.f32 %v932_v17  ;;  %v892_v50 = vsub.f32 0.0, %v860_v40  ;;  %v1837_v51 = vadd.f32 %v1754_v63, %v793_v7  ;;  %v1139_v52 = vsel %vm1107_vm1, %v1075_v45, %v1426_v36 }
 0x19e   :  { %v1430_v56 = vpop.eup %1429  ;;  %1443 = vrcp.f32 %v983_v48  ;;  %v711_v58 = vpop.permute.xlu0 %710  ;;  %1204 = vrot.lane.b32.xlu1 %v1139_v52, %s1606_s30  ;;  %v1840_v61 = vsel %vm1107_vm1, %v1426_v36, %v1075_v45 }
 0x19f   :  { %v1842_v1 = vpop.eup %1431  ;;  %v934_v5 = vmul.f32 1.442695, %v892_v50  ;;  %v861_v32 = vand.u32 2147483647, %v1837_v51  ;;  %v794_v25 = vsub.f32 %v1684_v10, %v711_v58  ;;  %v1076_v4 = vmul.f32 %v1430_v56, %v1418_v44 }
 0x1a0   :  { %v984_v6 = vadd.f32 1.0, %v1842_v1  ;;  %vm1117_vm11 = vcmp.ge.f32.partialorder %v1837_v51, 0.0 }
 0x1a1   :  { %1445 = vpow2.f32 %v934_v5  ;;  %v893_v29 = vsub.f32 0.0, %v861_v32  ;;  %v1849_v9 = vadd.f32 %v1754_v63, %v794_v25  ;;  %v1140_v11 = vsel %vm1108_vm2, %v1076_v4, %v1430_v56 }
 0x1a2   :  { %v1434_v20 = vpop.eup %1433  ;;  %1447 = vrcp.f32 %v984_v6  ;;  %v713_v34 = vpop.permute.xlu1 %712  ;;  %1206 = vrot.lane.b32.xlu0 %v1140_v11, %s1606_s30  ;;  %v1852_v21 = vsel %vm1108_vm2, %v1430_v56, %v1076_v4 }
 0x1a3   :  { %v1854_v14 = vpop.eup %1435  ;;  %v936_v10 = vmul.f32 1.442695, %v893_v29  ;;  %v862_v44 = vand.u32 2147483647, %v1849_v9  ;;  %v795_v43 = vsub.f32 %v1688_v16, %v713_v34  ;;  %v1077_v26 = vmul.f32 %v1434_v20, %v1810_v49 }
 0x1a4   :  { %v985_v59 = vadd.f32 1.0, %v1854_v14  ;;  %vm1118_vm12 = vcmp.ge.f32.partialorder %v1849_v9, 0.0 }
 0x1a5   :  { %1449 = vpow2.f32 %v936_v10  ;;  %v894_v33 = vsub.f32 0.0, %v862_v44  ;;  %v1862_v36 = vadd.f32 %v1754_v63, %v795_v43  ;;  %v1141_v37 = vsel %vm1109_vm3, %v1077_v26, %v1434_v20 }
 0x1a6   :  { %v1864_v17 = vpop.eup %1437  ;;  %1451 = vrcp.f32 %v985_v59  ;;  %v715_v40 = vpop.permute.xlu0 %714  ;;  %1208 = vrot.lane.b32.xlu1 %v1141_v37, %s1606_s30  ;;  %v1867_v7 = vsel %vm1109_vm3, %v1434_v20, %v1077_v26 }
 0x1a7   :  { %v1440_v16 = vpop.eup %1439  ;;  %v986_v49 = vadd.f32 1.0, %v1864_v17  ;;  %v938_v45 = vmul.f32 1.442695, %v894_v33  ;;  %v863_v24 = vand.u32 2147483647, %v1862_v36  ;;  %v796_v48 = vsub.f32 %v1692_v22, %v715_v40 }
 0x1a8   :  { %v1078_v50 = vmul.f32 %v1440_v16, %v1818_v18  ;;  %vm1119_vm13 = vcmp.ge.f32.partialorder %v1862_v36, 0.0 }
 0x1a9   :  { %1453 = vrcp.f32 %v986_v49  ;;  %v895_v52 = vsub.f32 0.0, %v863_v24  ;;  %v1874_v56 = vadd.f32 %v1754_v63, %v796_v48 }
 0x1aa   :  { %v1877_v58 = vpop.eup %1441  ;;  %1455 = vpow2.f32 %v938_v45  ;;  %v717_v5 = vpop.permute.xlu1 %716  ;;  %v1142_v32 = vsel %vm1110_vm4, %v1078_v50, %v1440_v16  ;;  %v1879_v25 = vsel %vm1110_vm4, %v1440_v16, %v1078_v50 }
 0x1ab   :  { %v1444_v4 = vpop.eup %1443  ;;  %v987_v6 = vadd.f32 1.0, %v1877_v58  ;;  %v940_v22 = vmul.f32 1.442695, %v895_v52  ;;  %v864_v18 = vand.u32 2147483647, %v1874_v56  ;;  %v797_v29 = vsub.f32 %v1696_v28, %v717_v5  ;;  %1210 = vrot.lane.b32.xlu0 %v1142_v32, %s1606_s30 }
 0x1ac   :  { %v1079_v11 = vmul.f32 %v1444_v4, %v1830_v0  ;;  %vm1120_vm14 = vcmp.ge.f32.partialorder %v1874_v56, 0.0 }
 0x1ad   :  { %1457 = vrcp.f32 %v987_v6  ;;  %v896_v3 = vsub.f32 0.0, %v864_v18  ;;  %v1887_v20 = vadd.f32 %v1754_v63, %v797_v29 }
 0x1ae   :  { %v1890_v34 = vpop.eup %1445  ;;  %1459 = vpow2.f32 %v940_v22  ;;  %v719_v10 = vpop.permute.xlu0 %718  ;;  %v1143_v44 = vsel %vm1111_vm5, %v1079_v11, %v1444_v4  ;;  %v1892_v43 = vsel %vm1111_vm5, %v1444_v4, %v1079_v11 }
 0x1af   :  { %v1448_v26 = vpop.eup %1447  ;;  %v988_v28 = vadd.f32 1.0, %v1890_v34  ;;  %v942_v59 = vmul.f32 1.442695, %v896_v3  ;;  %v865_v0 = vand.u32 2147483647, %v1887_v20  ;;  %v798_v33 = vsub.f32 %v1700_v35, %v719_v10  ;;  %1212 = vrot.lane.b32.xlu1 %v1143_v44, %s1606_s30 }
 0x1b0   :  { %v1080_v37 = vmul.f32 %v1448_v26, %v1842_v1  ;;  %vm1121_vm15 = vcmp.ge.f32.partialorder %v1887_v20, 0.0 }
 0x1b1   :  { %1461 = vrcp.f32 %v988_v28  ;;  %v897_v13 = vsub.f32 0.0, %v865_v0  ;;  %v1900_v40 = vadd.f32 %v1754_v63, %v798_v33 }
 0x1b2   :  { %v1903_v16 = vpop.eup %1449  ;;  %1463 = vpow2.f32 %v942_v59  ;;  %v721_v49 = vpop.permute.xlu1 %720  ;;  %v1144_v45 = vsel %vm1112_vm6, %v1080_v37, %v1448_v26  ;;  %v1905_v24 = vsel %vm1112_vm6, %v1448_v26, %v1080_v37 }
 0x1b3   :  { %v1452_v48 = vpop.eup %1451  ;;  %v989_v35 = vadd.f32 1.0, %v1903_v16  ;;  %v944_v50 = vmul.f32 1.442695, %v897_v13  ;;  %v866_v1 = vand.u32 2147483647, %v1900_v40  ;;  %v799_v52 = vsub.f32 %v1704_v41, %v721_v49  ;;  %1214 = vrot.lane.b32.xlu0 %v1144_v45, %s1606_s30 }
 0x1b4   :  { %v1081_v5 = vmul.f32 %v1452_v48, %v1854_v14  ;;  %vm1122_vm0 = vcmp.ge.f32.partialorder %v1900_v40, 0.0 }
 0x1b5   :  { %1465 = vrcp.f32 %v989_v35  ;;  %v898_v27 = vsub.f32 0.0, %v866_v1  ;;  %v1913_v32 = vadd.f32 %v1754_v63, %v799_v52 }
 0x1b6   :  { %v1454_v4 = vpop.eup %1453  ;;  %1467 = vpow2.f32 %v944_v50  ;;  %v723_v6 = vpop.permute.xlu0 %722  ;;  %v1145_v22 = vsel %vm1113_vm7, %v1081_v5, %v1452_v48  ;;  %v1916_v18 = vsel %vm1113_vm7, %v1452_v48, %v1081_v5 }
 0x1b7   :  { %v1918_v29 = vpop.eup %1455  ;;  %v946_v41 = vmul.f32 1.442695, %v898_v27  ;;  %v867_v11 = vand.u32 2147483647, %v1913_v32  ;;  %v800_v14 = vsub.f32 %v1708_v47, %v723_v6  ;;  %1216 = vrot.lane.b32.xlu1 %v1145_v22, %s1606_s30  ;;  %v1082_v3 = vmul.f32 %v1454_v4, %v1864_v17 }
 0x1b8   :  { %v990_v10 = vadd.f32 1.0, %v1918_v29  ;;  %vm1123_vm1 = vcmp.ge.f32.partialorder %v1913_v32, 0.0 }
 0x1b9   :  { %1469 = vpow2.f32 %v946_v41  ;;  %v899_v42 = vsub.f32 0.0, %v867_v11  ;;  %v1927_v44 = vadd.f32 %v1754_v63, %v800_v14  ;;  %v1146_v26 = vsel %vm1114_vm8, %v1082_v3, %v1454_v4 }
 0x1ba   :  { %v1458_v28 = vpop.eup %1457  ;;  %1471 = vrcp.f32 %v990_v10  ;;  %v725_v59 = vpop.permute.xlu1 %724  ;;  %1218 = vrot.lane.b32.xlu0 %v1146_v26, %s1606_s30  ;;  %v1930_v47 = vsel %vm1114_vm8, %v1454_v4, %v1082_v3 }
 0x1bb   :  { %v1932_v0 = vpop.eup %1459  ;;  %v948_v17 = vmul.f32 1.442695, %v899_v42  ;;  %v868_v33 = vand.u32 2147483647, %v1927_v44  ;;  %v801_v57 = vsub.f32 %v1712_v53, %v725_v59  ;;  %v1083_v37 = vmul.f32 %v1458_v28, %v1877_v58 }
 0x1bc   :  { %v991_v13 = vadd.f32 1.0, %v1932_v0  ;;  %vm1124_vm2 = vcmp.ge.f32.partialorder %v1927_v44, 0.0 }
 0x1bd   :  { %1473 = vpow2.f32 %v948_v17  ;;  %v900_v49 = vsub.f32 0.0, %v868_v33  ;;  %v1940_v45 = vadd.f32 %v1754_v63, %v801_v57  ;;  %v1147_v48 = vsel %vm1115_vm9, %v1083_v37, %v1458_v28 }
 0x1be   :  { %v1462_v35 = vpop.eup %1461  ;;  %1475 = vrcp.f32 %v991_v13  ;;  %v727_v50 = vpop.permute.xlu0 %726  ;;  %1220 = vrot.lane.b32.xlu1 %v1147_v48, %s1606_s30  ;;  %v1943_v1 = vsel %vm1115_vm9, %v1458_v28, %v1083_v37 }
 0x1bf   :  { %v1945_v53 = vpop.eup %1463  ;;  %v950_v58 = vmul.f32 1.442695, %v900_v49  ;;  %v869_v52 = vand.u32 2147483647, %v1940_v45  ;;  %v802_v54 = vsub.f32 %v1716_v60, %v727_v50  ;;  %v1084_v5 = vmul.f32 %v1462_v35, %v1890_v34 }
 0x1c0   :  { %v992_v27 = vadd.f32 1.0, %v1945_v53  ;;  %vm1125_vm3 = vcmp.ge.f32.partialorder %v1940_v45, 0.0 }
 0x1c1   :  { %1477 = vpow2.f32 %v950_v58  ;;  %v901_v4 = vsub.f32 0.0, %v869_v52  ;;  %v1953_v6 = vadd.f32 %v1754_v63, %v802_v54  ;;  %v1148_v22 = vsel %vm1116_vm10, %v1084_v5, %v1462_v35 }
 0x1c2   :  { %v1466_v41 = vpop.eup %1465  ;;  %1479 = vrcp.f32 %v992_v27  ;;  %v729_v11 = vpop.permute.xlu1 %728  ;;  %1222 = vrot.lane.b32.xlu0 %v1148_v22, %s1606_s30  ;;  %v1956_v14 = vsel %vm1116_vm10, %v1462_v35, %v1084_v5 }
 0x1c3   :  { %v1958_v60 = vpop.eup %1467  ;;  %v952_v34 = vmul.f32 1.442695, %v901_v4  ;;  %v870_v3 = vand.u32 2147483647, %v1953_v6  ;;  %v803_v39 = vsub.f32 %v1720_v2, %v729_v11  ;;  %v1085_v10 = vmul.f32 %v1466_v41, %v1903_v16 }
 0x1c4   :  { %v993_v42 = vadd.f32 1.0, %v1958_v60  ;;  %vm1126_vm4 = vcmp.ge.f32.partialorder %v1953_v6, 0.0 }
 0x1c5   :  { %1481 = vpow2.f32 %v952_v34  ;;  %v902_v26 = vsub.f32 0.0, %v870_v3  ;;  %v1966_v28 = vadd.f32 %v1754_v63, %v803_v39  ;;  %v1149_v59 = vsel %vm1117_vm11, %v1085_v10, %v1466_v41 }
 0x1c6   :  { %v1968_v17 = vpop.eup %1469  ;;  %1483 = vrcp.f32 %v993_v42  ;;  %v731_v33 = vpop.permute.xlu0 %730  ;;  %1224 = vrot.lane.b32.xlu1 %v1149_v59, %s1606_s30  ;;  %v1971_v57 = vsel %vm1117_vm11, %v1466_v41, %v1085_v10 }
 0x1c7   :  { %v1472_v2 = vpop.eup %1471  ;;  %v994_v16 = vadd.f32 1.0, %v1968_v17  ;;  %v954_v37 = vmul.f32 1.442695, %v902_v26  ;;  %v871_v51 = vand.u32 2147483647, %v1966_v28  ;;  %v804_v13 = vsub.f32 %v1724_v8, %v731_v33 }
 0x1c8   :  { %v1086_v49 = vmul.f32 %v1472_v2, %v1918_v29  ;;  %vm1127_vm5 = vcmp.ge.f32.partialorder %v1966_v28, 0.0 }
 0x1c9   :  { %1485 = vrcp.f32 %v994_v16  ;;  %v903_v48 = vsub.f32 0.0, %v871_v51  ;;  %v1978_v35 = vadd.f32 %v1754_v63, %v804_v13 }
 0x1ca   :  { %v1981_v50 = vpop.eup %1473  ;;  %1487 = vpow2.f32 %v954_v37  ;;  %v733_v58 = vpop.permute.xlu1 %732  ;;  %v1150_v52 = vsel %vm1118_vm12, %v1086_v49, %v1472_v2  ;;  %v1983_v54 = vsel %vm1118_vm12, %v1472_v2, %v1086_v49 }
 0x1cb   :  { %v1476_v5 = vpop.eup %1475  ;;  %v995_v27 = vadd.f32 1.0, %v1981_v50  ;;  %v956_v8 = vmul.f32 1.442695, %v903_v48  ;;  %v872_v29 = vand.u32 2147483647, %v1978_v35  ;;  %v805_v4 = vsub.f32 %v1728_v15, %v733_v58  ;;  %1226 = vrot.lane.b32.xlu0 %v1150_v52, %s1606_s30 }
 0x1cc   :  { %v1087_v22 = vmul.f32 %v1476_v5, %v1932_v0  ;;  %vm1128_vm6 = vcmp.ge.f32.partialorder %v1978_v35, 0.0 }
 0x1cd   :  { %1489 = vrcp.f32 %v995_v27  ;;  %v904_v9 = vsub.f32 0.0, %v872_v29  ;;  %v1991_v41 = vadd.f32 %v1754_v63, %v805_v4 }
 0x1ce   :  { %v1994_v11 = vpop.eup %1477  ;;  %1491 = vpow2.f32 %v956_v8  ;;  %v735_v34 = vpop.permute.xlu0 %734  ;;  %v1151_v3 = vsel %vm1119_vm13, %v1087_v22, %v1476_v5  ;;  %v1996_v39 = vsel %vm1119_vm13, %v1476_v5, %v1087_v22  ;;  %vm1298_vm13 = vcmask 7168  }
 0x1cf   :  { %v1480_v10 = vpop.eup %1479  ;;  %v996_v15 = vadd.f32 1.0, %v1994_v11  ;;  %v958_v42 = vmul.f32 1.442695, %v904_v9  ;;  %v873_v0 = vand.u32 2147483647, %v1991_v41  ;;  %v806_v26 = vsub.f32 %v1732_v23, %v735_v34  ;;  %1228 = vrot.lane.b32.xlu1 %v1151_v3, %s1606_s30 }
 0x1d0   :  { %v1088_v59 = vmul.f32 %v1480_v10, %v1945_v53  ;;  %vm1129_vm7 = vcmp.ge.f32.partialorder %v1991_v41, 0.0 }
 0x1d1   :  { %1493 = vrcp.f32 %v996_v15  ;;  %v905_v36 = vsub.f32 0.0, %v873_v0  ;;  %v2004_v33 = vadd.f32 %v1754_v63, %v806_v26 }
 0x1d2   :  { %v2007_v2 = vpop.eup %1481  ;;  %1495 = vpow2.f32 %v958_v42  ;;  %v737_v16 = vpop.permute.xlu1 %736  ;;  %v1152_v37 = vsel %vm1120_vm14, %v1088_v59, %v1480_v10  ;;  %v2009_v51 = vsel %vm1120_vm14, %v1480_v10, %v1088_v59  ;;  %vm1363_vm14 = vcmask 15368  }
 0x1d3   :  { %v1484_v13 = vpop.eup %1483  ;;  %v997_v23 = vadd.f32 1.0, %v2007_v2  ;;  %v960_v49 = vmul.f32 1.442695, %v905_v36  ;;  %v874_v53 = vand.u32 2147483647, %v2004_v33  ;;  %v807_v48 = vsub.f32 %v1736_v31, %v737_v16  ;;  %1230 = vrot.lane.b32.xlu0 %v1152_v37, %s1606_s30 }
 0x1d4   :  { %v1089_v58 = vmul.f32 %v1484_v13, %v1958_v60  ;;  %vm1130_vm8 = vcmp.ge.f32.partialorder %v2004_v33, 0.0 }
 0x1d5   :  { %1497 = vrcp.f32 %v997_v23  ;;  %v906_v56 = vsub.f32 0.0, %v874_v53  ;;  %v2017_v52 = vadd.f32 %v1754_v63, %v807_v48 }
 0x1d6   :  { %v1486_v5 = vpop.eup %1485  ;;  %1499 = vpow2.f32 %v960_v49  ;;  %v739_v27 = vpop.permute.xlu0 %738  ;;  %v1153_v8 = vsel %vm1121_vm15, %v1089_v58, %v1484_v13  ;;  %v2020_v29 = vsel %vm1121_vm15, %v1484_v13, %v1089_v58 }
 0x1d7   :  { %v2022_v4 = vpop.eup %1487  ;;  %v962_v31 = vmul.f32 1.442695, %v906_v56  ;;  %v875_v22 = vand.u32 2147483647, %v2017_v52  ;;  %v808_v60 = vsub.f32 %v1740_v38, %v739_v27  ;;  %1232 = vrot.lane.b32.xlu1 %v1153_v8, %s1606_s30  ;;  %v1090_v9 = vmul.f32 %v1486_v5, %v1968_v17 }
 0x1d8   :  { %v998_v34 = vadd.f32 1.0, %v2022_v4  ;;  %vm1131_vm9 = vcmp.ge.f32.partialorder %v2017_v52, 0.0 }
 0x1d9   :  { %1501 = vpow2.f32 %v962_v31  ;;  %v907_v20 = vsub.f32 0.0, %v875_v22  ;;  %v2031_v3 = vadd.f32 %v1754_v63, %v808_v60  ;;  %v1154_v10 = vsel %vm1122_vm0, %v1090_v9, %v1486_v5 }
 0x1da   :  { %v1490_v15 = vpop.eup %1489  ;;  %1503 = vrcp.f32 %v998_v34  ;;  %v741_v42 = vpop.permute.xlu1 %740  ;;  %1234 = vrot.lane.b32.xlu0 %v1154_v10, %s1606_s30  ;;  %v2034_v38 = vsel %vm1122_vm0, %v1486_v5, %v1090_v9 }
 0x1db   :  { %v2036_v0 = vpop.eup %1491  ;;  %v964_v17 = vmul.f32 1.442695, %v907_v20  ;;  %v876_v26 = vand.u32 2147483647, %v2031_v3  ;;  %v809_v40 = vsub.f32 %v1744_v46, %v741_v42  ;;  %v1091_v59 = vmul.f32 %v1490_v15, %v1981_v50 }
 0x1dc   :  { %v999_v36 = vadd.f32 1.0, %v2036_v0  ;;  %vm1132_vm10 = vcmp.ge.f32.partialorder %v2031_v3, 0.0 }
 0x1dd   :  { %1505 = vpow2.f32 %v964_v17  ;;  %v908_v16 = vsub.f32 0.0, %v876_v26  ;;  %v2044_v37 = vadd.f32 %v1754_v63, %v809_v40  ;;  %v1155_v13 = vsel %vm1123_vm1, %v1091_v59, %v1490_v15 }
 0x1de   :  { %v1494_v23 = vpop.eup %1493  ;;  %1507 = vrcp.f32 %v999_v36  ;;  %v743_v49 = vpop.permute.xlu0 %742  ;;  %1236 = vrot.lane.b32.xlu1 %v1155_v13, %s1606_s30  ;;  %v2047_v53 = vsel %vm1123_vm1, %v1490_v15, %v1091_v59 }
 0x1df   :  { %v2049_v46 = vpop.eup %1495  ;;  %v966_v50 = vmul.f32 1.442695, %v908_v16  ;;  %v877_v48 = vand.u32 2147483647, %v2044_v37  ;;  %v810_v32 = vsub.f32 %v1748_v55, %v743_v49  ;;  %v1092_v58 = vmul.f32 %v1494_v23, %v1994_v11 }
 0x1e0   :  { %v1000_v56 = vadd.f32 1.0, %v2049_v46  ;;  %vm1133_vm11 = vcmp.ge.f32.partialorder %v2044_v37, 0.0 }
 0x1e1   :  { %1509 = vpow2.f32 %v966_v50  ;;  %v909_v5 = vsub.f32 0.0, %v877_v48  ;;  %v2057_v27 = vadd.f32 %v1754_v63, %v810_v32  ;;  %v1156_v8 = vsel %vm1124_vm2, %v1092_v58, %v1494_v23 }
 0x1e2   :  { %v1498_v31 = vpop.eup %1497  ;;  %1511 = vrcp.f32 %v1000_v56  ;;  %v745_v22 = vpop.permute.xlu1 %744  ;;  %1238 = vrot.lane.b32.xlu0 %v1156_v8, %s1606_s30  ;;  %v2060_v60 = vsel %vm1124_vm2, %v1494_v23, %v1092_v58 }
 0x1e3   :  { %v2062_v55 = vpop.eup %1499  ;;  %v968_v11 = vmul.f32 1.442695, %v909_v5  ;;  %v878_v9 = vand.u32 2147483647, %v2057_v27  ;;  %v811_v44 = vsub.f32 %v1752_v62, %v745_v22  ;;  %v1093_v34 = vmul.f32 %v1498_v31, %v2007_v2 }
 0x1e4   :  { %v1001_v20 = vadd.f32 1.0, %v2062_v55  ;;  %vm1134_vm12 = vcmp.ge.f32.partialorder %v2057_v27, 0.0 }
 0x1e5   :  { %1513 = vpow2.f32 %v968_v11  ;;  %v910_v10 = vsub.f32 0.0, %v878_v9  ;;  %v2070_v15 = vadd.f32 %v1754_v63, %v811_v44  ;;  %v1157_v42 = vsel %vm1125_vm3, %v1093_v34, %v1498_v31 }
 0x1e6   :  { %v1502_v17 = vpop.eup %1501  ;;  %1515 = vrcp.f32 %v1001_v20  ;;  %v747_v26 = vpop.permute.xlu0 %746  ;;  %1240 = vrot.lane.b32.xlu1 %v1157_v42, %s1606_s30  ;;  %v2073_v40 = vsel %vm1125_vm3, %v1498_v31, %v1093_v34 }
 0x1e7   :  { %v1504_v62 = vpop.eup %1503  ;;  %v1002_v59 = vadd.f32 1.0, %v1502_v17  ;;  %v970_v2 = vmul.f32 1.442695, %v910_v10  ;;  %v879_v36 = vand.u32 2147483647, %v2070_v15  ;;  %v812_v45 = vsub.f32 %v1762_v12, %v747_v26 }
 0x1e8   :  { %v1094_v16 = vmul.f32 %v1504_v62, %v2022_v4  ;;  %vm1135_vm15 = vcmp.ge.f32.partialorder %v2070_v15, 0.0 }
 0x1e9   :  { %1517 = vrcp.f32 %v1002_v59  ;;  %v911_v13 = vsub.f32 0.0, %v879_v36  ;;  %v2079_v23 = vadd.f32 %v1754_v63, %v812_v45 }
 0x1ea   :  { %v1506_v49 = vpop.eup %1505  ;;  %1519 = vpow2.f32 %v970_v2  ;;  %v1158_v50 = vsel %vm1126_vm4, %v1094_v16, %v1504_v62  ;;  %v749_v48 = vpop.permute.xlu1 %748  ;;  %v2082_v32 = vsel %vm1126_vm4, %v1504_v62, %v1094_v16 }
 0x1eb   :  { %v1508_v58 = vpop.eup %1507  ;;  %v1003_v56 = vadd.f32 1.0, %v1506_v49  ;;  %v972_v5 = vmul.f32 1.442695, %v911_v13  ;;  %v880_v12 = vand.u32 2147483647, %v2079_v23  ;;  %1242 = vrot.lane.b32.xlu0 %v1158_v50, %s1606_s30  ;;  %v813_v4 = vsub.f32 %v1771_v30, %v749_v48 }
 0x1ec   :  { %v1095_v8 = vmul.f32 %v1508_v58, %v2036_v0  ;;  %vm1136_vm0 = vcmp.ge.f32.partialorder %v2079_v23, 0.0 }
 0x1ed   :  { %1521 = vrcp.f32 %v1003_v56  ;;  %v912_v31 = vsub.f32 0.0, %v880_v12  ;;  %v2089_v6 = vadd.f32 %v1754_v63, %v813_v4 }
 0x1ee   :  { %v1510_v22 = vpop.eup %1509  ;;  %1523 = vpow2.f32 %v972_v5  ;;  %v1159_v11 = vsel %vm1127_vm5, %v1095_v8, %v1508_v58  ;;  %v2092_v9 = vsel %vm1127_vm5, %v1508_v58, %v1095_v8 }
 0x1ef   :  { %v1512_v44 = vpop.eup %1511  ;;  %v1004_v34 = vadd.f32 1.0, %v1510_v22  ;;  %v974_v20 = vmul.f32 1.442695, %v912_v31  ;;  %v881_v10 = vand.u32 2147483647, %v2089_v6  ;;  %1244 = vrot.lane.b32.xlu1 %v1159_v11, %s1606_s30  ;;  %vm1137_vm1 = vcmp.ge.f32.partialorder %v2089_v6, 0.0 }
 0x1f0   :  { %v1096_v30 = vmul.f32 %v1512_v44, %v2049_v46 }
 0x1f1   :  { %1525 = vrcp.f32 %v1004_v34  ;;  %v913_v0 = vsub.f32 0.0, %v881_v10 }
 0x1f2   :  { %v1514_v63 = vpop.eup %1513  ;;  %1527 = vpow2.f32 %v974_v20  ;;  %v1160_v28 = vsel %vm1128_vm6, %v1096_v30, %v1512_v44  ;;  %v2098_v42 = vsel %vm1128_vm6, %v1512_v44, %v1096_v30 }
 0x1f3   :  { %v1516_v26 = vpop.eup %1515  ;;  %v1005_v62 = vadd.f32 1.0, %v1514_v63  ;;  %v976_v59 = vmul.f32 1.442695, %v913_v0  ;;  %1246 = vrot.lane.b32.xlu0 %v1160_v28, %s1606_s30 }
 0x1f4   :  { %v1097_v2 = vmul.f32 %v1516_v26, %v2062_v55 }
 0x1f5   :  { %1529 = vrcp.f32 %v1005_v62 }
 0x1f6   :  { %v1518_v46 = vpop.eup %1517  ;;  %1531 = vpow2.f32 %v976_v59  ;;  %v1161_v36 = vsel %vm1129_vm7, %v1097_v2, %v1516_v26  ;;  %v2103_v45 = vsel %vm1129_vm7, %v1516_v26, %v1097_v2 }
 0x1f7   :  { %v1520_v35 = vpop.eup %1519  ;;  %1248 = vrot.lane.b32.xlu1 %v1161_v36, %s1606_s30  ;;  %v1098_v16 = vmul.f32 %v1518_v46, %v1502_v17 }
 0x1f8   :  { %v1006_v13 = vadd.f32 1.0, %v1520_v35 }
 0x1f9   :  { %v1162_v50 = vsel %vm1130_vm8, %v1098_v16, %v1518_v46  ;;  %v2107_v48 = vsel %vm1130_vm8, %v1518_v46, %v1098_v16 }
 0x1fa   :  { %v1522_v58 = vpop.eup %1521  ;;  %1533 = vrcp.f32 %v1006_v13  ;;  %1250 = vrot.lane.b32.xlu0 %v1162_v50, %s1606_s30 }
 0x1fb   :  { %v1524_v41 = vpop.eup %1523  ;;  %v1099_v55 = vmul.f32 %v1522_v58, %v1506_v49 }
 0x1fc   :  { %v1007_v56 = vadd.f32 1.0, %v1524_v41 }
 0x1fd   :  { %v1163_v5 = vsel %vm1131_vm9, %v1099_v55, %v1522_v58  ;;  %v2111_v12 = vsel %vm1131_vm9, %v1522_v58, %v1099_v55 }
 0x1fe   :  { %v1526_v4 = vpop.eup %1525  ;;  %1535 = vrcp.f32 %v1007_v56  ;;  %1252 = vrot.lane.b32.xlu1 %v1163_v5, %s1606_s30 }
 0x1ff   :  { %v1528_v33 = vpop.eup %1527  ;;  %v1100_v17 = vmul.f32 %v1526_v4, %v1510_v22 }
 0x200   :  { %v1008_v8 = vadd.f32 1.0, %v1528_v33 }
 0x201   :  { %v1164_v31 = vsel %vm1132_vm10, %v1100_v17, %v1526_v4  ;;  %v2115_v11 = vsel %vm1132_vm10, %v1526_v4, %v1100_v17 }
 0x202   :  { %v1530_v44 = vpop.eup %1529  ;;  %1537 = vrcp.f32 %v1008_v8  ;;  %1254 = vrot.lane.b32.xlu0 %v1164_v31, %s1606_s30 }
 0x203   :  { %v1532_v52 = vpop.eup %1531  ;;  %v1101_v49 = vmul.f32 %v1530_v44, %v1514_v63 }
 0x204   :  { %v1009_v34 = vadd.f32 1.0, %v1532_v52 }
 0x205   :  { %v1165_v20 = vsel %vm1133_vm11, %v1101_v49, %v1530_v44  ;;  %v2119_v10 = vsel %vm1133_vm11, %v1530_v44, %v1101_v49 }
 0x206   :  { %1539 = vrcp.f32 %v1009_v34  ;;  %1256 = vrot.lane.b32.xlu1 %v1165_v20, %s1606_s30 }
 0x207   :  { %v1534_v22 = vpop.eup %1533 }
 0x208   :  { %v1102_v3 = vmul.f32 %v1534_v22, %v1520_v35 }
 0x20a   :  { %v1166_v30 = vsel %vm1134_vm12, %v1102_v3, %v1534_v22  ;;  %v2123_v0 = vsel %vm1134_vm12, %v1534_v22, %v1102_v3 }
 0x20b   :  { %v1536_v28 = vpop.eup %1535  ;;  %1258 = vrot.lane.b32.xlu0 %v1166_v30, %s1606_s30 }
 0x20c   :  { %v1203_v63 = vpop.permute.xlu0 %1202  ;;  %v1103_v37 = vmul.f32 %v1536_v28, %v1524_v41 }
 0x20d   :  { %1299 = vst.msk [vmem:[%s2429_s3] sm:$0xff] %vm1298_vm13, %v1203_v63 }
 0x20e   :  { %1364 = vst.msk [vmem:[%s2429_s3] sm:$0xff] %vm1363_vm14, %v1828_v19  ;;  %v1167_v27 = vsel %vm1135_vm15, %v1103_v37, %v1536_v28  ;;  %v2136_v26 = vsel %vm1135_vm15, %v1536_v28, %v1103_v37 }
 0x20f   :  { %v1538_v62 = vpop.eup %1537  ;;  %1260 = vrot.lane.b32.xlu1 %v1167_v27, %s1606_s30 }
 0x210   :  { %v1205_v59 = vpop.permute.xlu1 %1204  ;;  %v1104_v2 = vmul.f32 %v1538_v62, %v1528_v33 }
 0x211   :  { %1300 = vst.msk [vmem:[%s2429_s3 + $0x8] sm:$0xff] %vm1298_vm13, %v1205_v59 }
 0x212   :  { %1365 = vst.msk [vmem:[%s2429_s3 + $0x8] sm:$0xff] %vm1363_vm14, %v1840_v61  ;;  %v1168_v19 = vsel %vm1136_vm0, %v1104_v2, %v1538_v62  ;;  %v2149_v15 = vsel %vm1136_vm0, %v1538_v62, %v1104_v2 }
 0x213   :  { %v1540_v46 = vpop.eup %1539  ;;  %1262 = vrot.lane.b32.xlu0 %v1168_v19, %s1606_s30 }
 0x214   :  { %v1207_v36 = vpop.permute.xlu0 %1206  ;;  %v1105_v35 = vmul.f32 %v1540_v46, %v1532_v52 }
 0x215   :  { %1301 = vst.msk [vmem:[%s2429_s3 + $0x10] sm:$0xff] %vm1298_vm13, %v1207_v36 }
 0x216   :  { %1366 = vst.msk [vmem:[%s2429_s3 + $0x10] sm:$0xff] %vm1363_vm14, %v1852_v21  ;;  %v1169_v61 = vsel %vm1137_vm1, %v1105_v35, %v1540_v46  ;;  %v2162_v23 = vsel %vm1137_vm1, %v1540_v46, %v1105_v35 }
 0x217   :  { %1264 = vrot.lane.b32.xlu1 %v1169_v61, %s1606_s30 }
 0x218   :  { %v1209_v16 = vpop.permute.xlu1 %1208 }
 0x219   :  { %1302 = vst.msk [vmem:[%s2429_s3 + $0x18] sm:$0xff] %vm1298_vm13, %v1209_v16 }
 0x21a   :  { %1367 = vst.msk [vmem:[%s2429_s3 + $0x18] sm:$0xff] %vm1363_vm14, %v1867_v7 }
 0x21d   :  { %v1211_v6 = vpop.permute.xlu0 %1210 }
 0x21e   :  { %1303 = vst.msk [vmem:[%s2429_s3 + $0x20] sm:$0xff] %vm1298_vm13, %v1211_v6 }
 0x21f   :  { %1368 = vst.msk [vmem:[%s2429_s3 + $0x20] sm:$0xff] %vm1363_vm14, %v1879_v25 }
 0x221   :  { %v1213_v21 = vpop.permute.xlu1 %1212 }
 0x222   :  { %1304 = vst.msk [vmem:[%s2429_s3 + $0x28] sm:$0xff] %vm1298_vm13, %v1213_v21 }
 0x223   :  { %1369 = vst.msk [vmem:[%s2429_s3 + $0x28] sm:$0xff] %vm1363_vm14, %v1892_v43 }
 0x225   :  { %v1215_v7 = vpop.permute.xlu0 %1214 }
 0x226   :  { %1305 = vst.msk [vmem:[%s2429_s3 + $0x30] sm:$0xff] %vm1298_vm13, %v1215_v7 }
 0x227   :  { %1370 = vst.msk [vmem:[%s2429_s3 + $0x30] sm:$0xff] %vm1363_vm14, %v1905_v24 }
 0x229   :  { %v1217_v25 = vpop.permute.xlu1 %1216 }
 0x22a   :  { %1306 = vst.msk [vmem:[%s2429_s3 + $0x38] sm:$0xff] %vm1298_vm13, %v1217_v25 }
 0x22b   :  { %1371 = vst.msk [vmem:[%s2429_s3 + $0x38] sm:$0xff] %vm1363_vm14, %v1916_v18 }
 0x22c   :  { %v1219_v43 = vpop.permute.xlu0 %1218 }
 0x22d   :  { %1307 = vst.msk [vmem:[%s2429_s3 + $0x40] sm:$0xff] %vm1298_vm13, %v1219_v43 }
 0x22e   :  { %1372 = vst.msk [vmem:[%s2429_s3 + $0x40] sm:$0xff] %vm1363_vm14, %v1930_v47 }
 0x230   :  { %v1221_v24 = vpop.permute.xlu1 %1220 }
 0x231   :  { %1308 = vst.msk [vmem:[%s2429_s3 + $0x48] sm:$0xff] %vm1298_vm13, %v1221_v24 }
 0x232   :  { %1373 = vst.msk [vmem:[%s2429_s3 + $0x48] sm:$0xff] %vm1363_vm14, %v1943_v1 }
 0x234   :  { %v1223_v18 = vpop.permute.xlu0 %1222 }
 0x235   :  { %1309 = vst.msk [vmem:[%s2429_s3 + $0x50] sm:$0xff] %vm1298_vm13, %v1223_v18 }
 0x236   :  { %1374 = vst.msk [vmem:[%s2429_s3 + $0x50] sm:$0xff] %vm1363_vm14, %v1956_v14 }
 0x238   :  { %v1225_v47 = vpop.permute.xlu1 %1224 }
 0x239   :  { %1310 = vst.msk [vmem:[%s2429_s3 + $0x58] sm:$0xff] %vm1298_vm13, %v1225_v47 }
 0x23a   :  { %1375 = vst.msk [vmem:[%s2429_s3 + $0x58] sm:$0xff] %vm1363_vm14, %v1971_v57 }
 0x23d   :  { %v1227_v1 = vpop.permute.xlu0 %1226 }
 0x23e   :  { %1311 = vst.msk [vmem:[%s2429_s3 + $0x60] sm:$0xff] %vm1298_vm13, %v1227_v1 }
 0x23f   :  { %1376 = vst.msk [vmem:[%s2429_s3 + $0x60] sm:$0xff] %vm1363_vm14, %v1983_v54 }
 0x241   :  { %v1229_v14 = vpop.permute.xlu1 %1228 }
 0x242   :  { %1312 = vst.msk [vmem:[%s2429_s3 + $0x68] sm:$0xff] %vm1298_vm13, %v1229_v14 }
 0x243   :  { %1377 = vst.msk [vmem:[%s2429_s3 + $0x68] sm:$0xff] %vm1363_vm14, %v1996_v39 }
 0x245   :  { %v1231_v57 = vpop.permute.xlu0 %1230 }
 0x246   :  { %1313 = vst.msk [vmem:[%s2429_s3 + $0x70] sm:$0xff] %vm1298_vm13, %v1231_v57 }
 0x247   :  { %1378 = vst.msk [vmem:[%s2429_s3 + $0x70] sm:$0xff] %vm1363_vm14, %v2009_v51 }
 0x249   :  { %v1233_v54 = vpop.permute.xlu1 %1232 }
 0x24a   :  { %1314 = vst.msk [vmem:[%s2429_s3 + $0x78] sm:$0xff] %vm1298_vm13, %v1233_v54 }
 0x24b   :  { %1379 = vst.msk [vmem:[%s2429_s3 + $0x78] sm:$0xff] %vm1363_vm14, %v2020_v29 }
 0x24c   :  { %v1235_v39 = vpop.permute.xlu0 %1234 }
 0x24d   :  { %1315 = vst.msk [vmem:[%s2429_s3 + $0x80] sm:$0xff] %vm1298_vm13, %v1235_v39 }
 0x24e   :  { %1380 = vst.msk [vmem:[%s2429_s3 + $0x80] sm:$0xff] %vm1363_vm14, %v2034_v38 }
 0x250   :  { %v1237_v51 = vpop.permute.xlu1 %1236 }
 0x251   :  { %1316 = vst.msk [vmem:[%s2429_s3 + $0x88] sm:$0xff] %vm1298_vm13, %v1237_v51 }
 0x252   :  { %1381 = vst.msk [vmem:[%s2429_s3 + $0x88] sm:$0xff] %vm1363_vm14, %v2047_v53 }
 0x254   :  { %v1239_v29 = vpop.permute.xlu0 %1238 }
 0x255   :  { %1317 = vst.msk [vmem:[%s2429_s3 + $0x90] sm:$0xff] %vm1298_vm13, %v1239_v29 }
 0x256   :  { %1382 = vst.msk [vmem:[%s2429_s3 + $0x90] sm:$0xff] %vm1363_vm14, %v2060_v60 }
 0x258   :  { %v1241_v38 = vpop.permute.xlu1 %1240 }
 0x259   :  { %1318 = vst.msk [vmem:[%s2429_s3 + $0x98] sm:$0xff] %vm1298_vm13, %v1241_v38 }
 0x25a   :  { %1383 = vst.msk [vmem:[%s2429_s3 + $0x98] sm:$0xff] %vm1363_vm14, %v2073_v40 }
 0x25d   :  { %v1243_v53 = vpop.permute.xlu0 %1242 }
 0x25e   :  { %1319 = vst.msk [vmem:[%s2429_s3 + $0xa0] sm:$0xff] %vm1298_vm13, %v1243_v53 }
 0x25f   :  { %1384 = vst.msk [vmem:[%s2429_s3 + $0xa0] sm:$0xff] %vm1363_vm14, %v2082_v32 }
 0x261   :  { %v1245_v60 = vpop.permute.xlu1 %1244 }
 0x262   :  { %1320 = vst.msk [vmem:[%s2429_s3 + $0xa8] sm:$0xff] %vm1298_vm13, %v1245_v60 }
 0x263   :  { %1385 = vst.msk [vmem:[%s2429_s3 + $0xa8] sm:$0xff] %vm1363_vm14, %v2092_v9 }
 0x265   :  { %v1247_v40 = vpop.permute.xlu0 %1246 }
 0x266   :  { %1321 = vst.msk [vmem:[%s2429_s3 + $0xb0] sm:$0xff] %vm1298_vm13, %v1247_v40 }
 0x267   :  { %1386 = vst.msk [vmem:[%s2429_s3 + $0xb0] sm:$0xff] %vm1363_vm14, %v2098_v42 }
 0x269   :  { %v1249_v32 = vpop.permute.xlu1 %1248 }
 0x26a   :  { %1322 = vst.msk [vmem:[%s2429_s3 + $0xb8] sm:$0xff] %vm1298_vm13, %v1249_v32 }
 0x26b   :  { %1387 = vst.msk [vmem:[%s2429_s3 + $0xb8] sm:$0xff] %vm1363_vm14, %v2103_v45 }
 0x26c   :  { %v1251_v9 = vpop.permute.xlu0 %1250 }
 0x26d   :  { %1323 = vst.msk [vmem:[%s2429_s3 + $0xc0] sm:$0xff] %vm1298_vm13, %v1251_v9 }
 0x26e   :  { %1388 = vst.msk [vmem:[%s2429_s3 + $0xc0] sm:$0xff] %vm1363_vm14, %v2107_v48 }
 0x270   :  { %v1253_v42 = vpop.permute.xlu1 %1252 }
 0x271   :  { %1324 = vst.msk [vmem:[%s2429_s3 + $0xc8] sm:$0xff] %vm1298_vm13, %v1253_v42 }
 0x272   :  { %1389 = vst.msk [vmem:[%s2429_s3 + $0xc8] sm:$0xff] %vm1363_vm14, %v2111_v12 }
 0x274   :  { %v1255_v45 = vpop.permute.xlu0 %1254 }
 0x275   :  { %1325 = vst.msk [vmem:[%s2429_s3 + $0xd0] sm:$0xff] %vm1298_vm13, %v1255_v45 }
 0x276   :  { %1390 = vst.msk [vmem:[%s2429_s3 + $0xd0] sm:$0xff] %vm1363_vm14, %v2115_v11 }
 0x278   :  { %v1257_v13 = vpop.permute.xlu1 %1256 }
 0x279   :  { %1326 = vst.msk [vmem:[%s2429_s3 + $0xd8] sm:$0xff] %vm1298_vm13, %v1257_v13 }
 0x27a   :  { %1391 = vst.msk [vmem:[%s2429_s3 + $0xd8] sm:$0xff] %vm1363_vm14, %v2119_v10 }
 0x27d   :  { %v1259_v50 = vpop.permute.xlu0 %1258 }
 0x27e   :  { %1327 = vst.msk [vmem:[%s2429_s3 + $0xe0] sm:$0xff] %vm1298_vm13, %v1259_v50 }
 0x27f   :  { %1392 = vst.msk [vmem:[%s2429_s3 + $0xe0] sm:$0xff] %vm1363_vm14, %v2123_v0 }
 0x281   :  { %v1261_v48 = vpop.permute.xlu1 %1260 }
 0x282   :  { %1328 = vst.msk [vmem:[%s2429_s3 + $0xe8] sm:$0xff] %vm1298_vm13, %v1261_v48 }
 0x283   :  { %1393 = vst.msk [vmem:[%s2429_s3 + $0xe8] sm:$0xff] %vm1363_vm14, %v2136_v26 }
 0x285   :  { %v1263_v58 = vpop.permute.xlu0 %1262 }
 0x286   :  { %1329 = vst.msk [vmem:[%s2429_s3 + $0xf0] sm:$0xff] %vm1298_vm13, %v1263_v58 }
 0x287   :  { %1394 = vst.msk [vmem:[%s2429_s3 + $0xf0] sm:$0xff] %vm1363_vm14, %v2149_v15 }
 0x289   :  { %v1265_v41 = vpop.permute.xlu1 %1264 }
 0x28a   :  { %1330 = vst.msk [vmem:[%s2429_s3 + $0xf8] sm:$0xff] %vm1298_vm13, %v1265_v41 }
 0x28b   :  { %1395 = vst.msk [vmem:[%s2429_s3 + $0xf8] sm:$0xff] %vm1363_vm14, %v2162_v23 }
 0x28c   :  { %1400 = vsyncpa [#allocation3], 1 }
 0x28d   :  { %1401 = vsyncpa [#allocation6], 1 }
 0x28e   :  { %1402 = vsyncpa [#allocation4], 1 }

</bundles_post_ra>
